<compile_context>
chip_gen: v7x
topology: tpu7x:2x2x1
jax: 0.10.0
libtpu: 0.0.40
codegen_flags: <defaults>
</compile_context>

<pallas_src>
import functools

import jax
import jax.numpy as jnp
from jax.experimental import pallas as pl
from jax.experimental.pallas import tpu as pltpu


# --------------------------------------------------------------------------------------
# Kernels
# --------------------------------------------------------------------------------------
def _conv1_kernel(x_ref, w_ref, y_ref, s1_ref, s2_ref, col_ref, *, h, w):
    """Layer 1: conv3x3 as a single K=9*Cin matmul + per-image BN partial sums.

    x_ref : (Cin, R0) bf16   padded, flattened (channels-major) input image
    w_ref : (C1, 9*Cin) bf16 folded weights, column t*Cin+cin with t = ky*3+kx
    y_ref : (C1, MR) bf16    compact pre-BN conv output (junk columns included)
    s1/s2 : (C1, 1) f32      sum / sum-of-squares over this image's valid pixels
    col_ref: VMEM (9*Cin, MR) bf16 scratch (in-VMEM im2col)
    """
    wp = w + 2
    mr = h * wp
    cin = x_ref.shape[0]
    # im2col: row-block t holds the tap-(ky,kx) shifted window (VMEM-only duplication).
    for t in range(9):
        ky, kx = divmod(t, 3)
        off = ky * wp + kx
        col_ref[t * cin:(t + 1) * cin, :] = x_ref[:, off:off + mr]
    acc = jnp.dot(w_ref[...], col_ref[...],
                  preferred_element_type=jnp.float32)              # (C1, MR) f32
    # valid-pixel mask generated in-kernel (no HBM mask input)
    lane = jax.lax.broadcasted_iota(jnp.int32, (1, mr), 1)
    valid = (lane % wp) < w
    accm = jnp.where(valid, acc, 0.0)
    s1_ref[...] = jnp.sum(accm, axis=1, keepdims=True)
    s2_ref[...] = jnp.sum(accm * acc, axis=1, keepdims=True)
    y_ref[...] = acc.astype(y_ref.dtype)                           # compact bf16 store


def _conv2_kernel(y1_ref, sc_ref, sh_ref, w_ref, sel_ref, y_ref, s1_ref, s2_ref,
                  pad_ref, col_ref, *, h, w):
    """Layer 2: fused BN1+ReLU, conv3x3 (one matmul), junk-column drop, BN partial sums.

    y1_ref : (C1, MR) bf16   layer-1 pre-BN output (compact, with junk columns)
    sc/sh  : (C1, 1) f32     BN1 scale / shift (global batch statistics)
    w_ref  : (C2, 9*C1) bf16 folded weights
    sel_ref: (MR, HW) f32    0/1 selection matrix: drops junk columns, keeps lane-density
    y_ref  : (C2, HW) f32    layer-2 pre-BN conv output (lane-dense, no junk)
    s1/s2  : (C2, 1) f32     BN2 partial sums for this image
    pad_ref: VMEM (C1, R0) bf16   zero-padded post-activation input
    col_ref: VMEM (9*C1, MR) bf16 im2col scratch
    """
    wp = w + 2
    mr = h * wp
    c1 = y1_ref.shape[0]
    a = jnp.maximum(y1_ref[...].astype(jnp.float32) * sc_ref[...] + sh_ref[...], 0.0)
    lane = jax.lax.broadcasted_iota(jnp.int32, (1, mr), 1)
    a = jnp.where((lane % wp) < w, a, 0.0)        # select (not multiply): kill junk cols
    # build the zero-padded activation in VMEM; the compact block is just a shift of the
    # padded interior (offset wp+1), junk positions land exactly on padding slots.
    pad_ref[...] = jnp.zeros_like(pad_ref)
    pad_ref[:, wp + 1:wp + 1 + mr] = a.astype(pad_ref.dtype)
    for t in range(9):
        ky, kx = divmod(t, 3)
        off = ky * wp + kx
        col_ref[t * c1:(t + 1) * c1, :] = pad_ref[:, off:off + mr]
    acc = jnp.dot(w_ref[...], col_ref[...],
                  preferred_element_type=jnp.float32)              # (C2, MR) f32
    # drop junk columns (MR -> H*W) with an exact 0/1 selection matmul; output stays
    # channel-major so the final NCHW reshape is free and BN2 stats need no mask.
    acc_c = jnp.dot(acc, sel_ref[...],
                    preferred_element_type=jnp.float32)            # (C2, HW) f32
    s1_ref[...] = jnp.sum(acc_c, axis=1, keepdims=True)
    s2_ref[...] = jnp.sum(acc_c * acc_c, axis=1, keepdims=True)
    y_ref[...] = acc_c


def _bn_relu_kernel(y_ref, sc_ref, sh_ref, o_ref):
    """Final BN2 + ReLU (elementwise f32, lane-dense (C2, H*W) blocks)."""
    o_ref[...] = jnp.maximum(y_ref[...] * sc_ref[...] + sh_ref[...], 0.0)


# --------------------------------------------------------------------------------------
# Host wrapper
# --------------------------------------------------------------------------------------
def _stats_to_affine(s1, s2, gamma, beta, count, eps=1e-5):
    """Global batch mean/var (biased, PyTorch BN fwd) -> per-channel scale/shift."""
    mean = s1 / count
    var = jnp.maximum(s2 / count - mean * mean, 0.0)
    scale = gamma * jax.lax.rsqrt(var + eps)
    shift = beta - mean * scale
    return scale.astype(jnp.float32), shift.astype(jnp.float32)


@jax.jit
def resnet_block(x, w1, g1, b1, w2, g2, b2):
    """Forward of ResnetBlock: conv1(x) then conv2(.) — NCHW in, NCHW out."""
    n, c_in, h, w = x.shape
    c1, c2 = w1.shape[0], w2.shape[0]
    hp, wp = h + 2, w + 2
    mr = h * wp                 # flat conv-output columns per image (2 junk cols per row)
    hw = h * w
    r0 = hp * wp + 2            # padded-flat length (+2 spare so the last tap is in range)

    # channels-major (= NCHW order) padded, flattened, bf16 input: (N, Cin, R0).
    xp = jnp.pad(x, ((0, 0), (0, 0), (1, 1), (1, 1)))
    xt = jnp.pad(xp.reshape(n, c_in, hp * wp),
                 ((0, 0), (0, 0), (0, 2))).astype(jnp.bfloat16)

    # weights: (Cout, Cin, 3, 3) -> (Cout, 9*Cin), column t*Cin+cin with t = ky*3+kx
    w1m = jnp.transpose(w1, (0, 2, 3, 1)).reshape(c1, 9 * c_in).astype(jnp.bfloat16)
    w2m = jnp.transpose(w2, (0, 2, 3, 1)).reshape(c2, 9 * c1).astype(jnp.bfloat16)

    # 0/1 selection matrix: flat padded index s -> compact pixel index p (junk cols drop)
    s_idx = jnp.arange(mr)
    p_idx = (s_idx // wp) * w + (s_idx % wp)
    sel = (((s_idx % wp) < w)[:, None] &
           (p_idx[:, None] == jnp.arange(hw)[None, :])).astype(jnp.float32)

    cparams = pltpu.CompilerParams(dimension_semantics=("parallel",),
                                   vmem_limit_bytes=32 * 1024 * 1024)

    def per_img(d0, d1):        # per-image block, batch dim squeezed away
        return pl.BlockSpec((None, d0, d1), lambda i: (i, 0, 0))

    def shared(d0, d1):         # resident across grid steps (constant block index)
        return pl.BlockSpec((d0, d1), lambda i: (0, 0))

    # ---- layer 1: conv1 + per-image BN partial sums ------------------------------------
    y1, s1a, s2a = pl.pallas_call(
        functools.partial(_conv1_kernel, h=h, w=w),
        grid=(n,),
        in_specs=[per_img(c_in, r0), shared(c1, 9 * c_in)],
        out_specs=(per_img(c1, mr), per_img(c1, 1), per_img(c1, 1)),
        out_shape=(jax.ShapeDtypeStruct((n, c1, mr), jnp.bfloat16),
                   jax.ShapeDtypeStruct((n, c1, 1), jnp.float32),
                   jax.ShapeDtypeStruct((n, c1, 1), jnp.float32)),
        scratch_shapes=[pltpu.VMEM((9 * c_in, mr), jnp.bfloat16)],
        compiler_params=cparams,
    )(xt, w1m)

    scale1, shift1 = _stats_to_affine(jnp.sum(s1a, axis=(0, 2)),
                                      jnp.sum(s2a, axis=(0, 2)), g1, b1, n * h * w)

    # ---- layer 2: BN1+ReLU fused on the input, conv2 + per-image BN partial sums -------
    y2, s1b, s2b = pl.pallas_call(
        functools.partial(_conv2_kernel, h=h, w=w),
        grid=(n,),
        in_specs=[per_img(c1, mr), shared(c1, 1), shared(c1, 1),
                  shared(c2, 9 * c1), shared(mr, hw)],
        out_specs=(per_img(c2, hw), per_img(c2, 1), per_img(c2, 1)),
        out_shape=(jax.ShapeDtypeStruct((n, c2, hw), jnp.float32),
                   jax.ShapeDtypeStruct((n, c2, 1), jnp.float32),
                   jax.ShapeDtypeStruct((n, c2, 1), jnp.float32)),
        scratch_shapes=[pltpu.VMEM((c1, r0), jnp.bfloat16),
                        pltpu.VMEM((9 * c1, mr), jnp.bfloat16)],
        compiler_params=cparams,
    )(y1, scale1.reshape(c1, 1), shift1.reshape(c1, 1), w2m, sel)

    scale2, shift2 = _stats_to_affine(jnp.sum(s1b, axis=(0, 2)),
                                      jnp.sum(s2b, axis=(0, 2)), g2, b2, n * h * w)

    # ---- final BN2 + ReLU (lane-dense) --------------------------------------------------
    out = pl.pallas_call(
        _bn_relu_kernel,
        grid=(n,),
        in_specs=[per_img(c2, hw), shared(c2, 1), shared(c2, 1)],
        out_specs=per_img(c2, hw),
        out_shape=jax.ShapeDtypeStruct((n, c2, hw), jnp.float32),
        compiler_params=cparams,
    )(y2, scale2.reshape(c2, 1), shift2.reshape(c2, 1))

    # output is already channel-major: the NCHW reshape is free (no data movement)
    return out.reshape(n, c2, h, w)


# --------------------------------------------------------------------------------------
# Pure-JAX reference mirroring the kernel's mixed precision
# (bf16 conv inputs, f32 accumulation/statistics, bf16 storage of the layer-1 output).
# --------------------------------------------------------------------------------------
def _ref_layer(x, w, gamma, beta, store_bf16):
    y = jax.lax.conv_general_dilated(
        x.astype(jnp.bfloat16), w.astype(jnp.bfloat16),
        window_strides=(1, 1), padding=((1, 1), (1, 1)),
        dimension_numbers=("NCHW", "OIHW", "NCHW"),
        preferred_element_type=jnp.float32)
    cnt = y.shape[0] * y.shape[2] * y.shape[3]
    mean = jnp.sum(y, axis=(0, 2, 3)) / cnt
    var = jnp.maximum(jnp.sum(y * y, axis=(0, 2, 3)) / cnt - mean * mean, 0.0)
    scale = gamma * jax.lax.rsqrt(var + 1e-5)
    shift = beta - mean * scale
    if store_bf16:                       # kernel stores the layer-1 intermediate as bf16
        y = y.astype(jnp.bfloat16).astype(jnp.float32)
    return jnp.maximum(y * scale.reshape(1, -1, 1, 1) + shift.reshape(1, -1, 1, 1), 0.0)


def resnet_block_ref(x, w1, g1, b1, w2, g2, b2):
    a = _ref_layer(x, w1, g1, b1, store_bf16=True)
    return _ref_layer(a, w2, g2, b2, store_bf16=False)


if __name__ == "__main__":
    # ResnetBlock(in_channels=4, out_channels=4) — forward requires in == out.
    N, C, H, W = 2, 4, 16, 16
    keys = jax.random.split(jax.random.PRNGKey(0), 7)
    x = jax.random.normal(keys[0], (N, C, H, W), jnp.float32)
    w1 = 0.2 * jax.random.normal(keys[1], (C, C, 3, 3), jnp.float32)
    w2 = 0.2 * jax.random.normal(keys[2], (C, C, 3, 3), jnp.float32)
    g1 = 1.0 + 0.1 * jax.random.normal(keys[3], (C,), jnp.float32)
    b1 = 0.1 * jax.random.normal(keys[4], (C,), jnp.float32)
    g2 = 1.0 + 0.1 * jax.random.normal(keys[5], (C,), jnp.float32)
    b2 = 0.1 * jax.random.normal(keys[6], (C,), jnp.float32)

    y = jax.block_until_ready(resnet_block(x, w1, g1, b1, w2, g2, b2))
    y_ref = jax.block_until_ready(resnet_block_ref(x, w1, g1, b1, w2, g2, b2))

    assert y.shape == (N, C, H, W), y.shape
    err = float(jnp.max(jnp.abs(y - y_ref)))
    assert jnp.allclose(y, y_ref, atol=5e-3, rtol=5e-3), err
    print("KERNEL_OK")
</pallas_src>

<mosaic_0001>
module attributes {stable_mosaic.version = 11 : i64} {
  func.func @_bn_relu_kernel(%arg0: i32, %arg1: memref<1x4x256xf32, #tpu.memory_space<vmem>>, %arg2: memref<4x1xf32, #tpu.memory_space<vmem>>, %arg3: memref<4x1xf32, #tpu.memory_space<vmem>>, %arg4: memref<1x4x256xf32, #tpu.memory_space<vmem>>) attributes {dimension_semantics = [#tpu.dimension_semantics<parallel>], iteration_bounds = array<i64: 2>, scalar_prefetch = 0 : i64, scratch_operands = 0 : i64, tpu.core_type = #tpu.core_type<tc>, window_params = [{transform_indices = @transform_0, window_bounds = array<i64: 1, 4, 256>}, {pipeline_mode = #tpu.pipeline_mode<synchronous>, transform_indices = @transform_1, window_bounds = array<i64: 4, 1>}, {pipeline_mode = #tpu.pipeline_mode<synchronous>, transform_indices = @transform_2, window_bounds = array<i64: 4, 1>}, {transform_indices = @transform_3, window_bounds = array<i64: 1, 4, 256>}]} {
    %c0 = arith.constant 0 : index
    %c0_0 = arith.constant 0 : index
    %c0_1 = arith.constant 0 : index
    %0 = vector.load %arg1[%c0, %c0_0, %c0_1] : memref<1x4x256xf32, #tpu.memory_space<vmem>>, vector<1x4x256xf32>
    %1 = vector.shape_cast %0 : vector<1x4x256xf32> to vector<4x256xf32>
    %c0_2 = arith.constant 0 : index
    %c0_3 = arith.constant 0 : index
    %2 = vector.load %arg2[%c0_2, %c0_3] : memref<4x1xf32, #tpu.memory_space<vmem>>, vector<4x1xf32>
    %3 = vector.broadcast %2 : vector<4x1xf32> to vector<4x256xf32>
    %4 = arith.mulf %1, %3 : vector<4x256xf32>
    %c0_4 = arith.constant 0 : index
    %c0_5 = arith.constant 0 : index
    %5 = vector.load %arg3[%c0_4, %c0_5] : memref<4x1xf32, #tpu.memory_space<vmem>>, vector<4x1xf32>
    %6 = vector.broadcast %5 : vector<4x1xf32> to vector<4x256xf32>
    %7 = arith.addf %4, %6 : vector<4x256xf32>
    %cst = arith.constant 0.000000e+00 : f32
    %8 = vector.broadcast %cst : f32 to vector<4x256xf32>
    %9 = arith.maximumf %7, %8 : vector<4x256xf32>
    %c0_6 = arith.constant 0 : index
    %c0_7 = arith.constant 0 : index
    %c0_8 = arith.constant 0 : index
    %10 = vector.load %arg4[%c0_6, %c0_7, %c0_8] : memref<1x4x256xf32, #tpu.memory_space<vmem>>, vector<1x4x256xf32>
    %11 = vector.shape_cast %10 : vector<1x4x256xf32> to vector<4x256xf32>
    %12 = vector.shape_cast %9 : vector<4x256xf32> to vector<1x4x256xf32>
    tpu.vector_store %arg4[%c0_6, %c0_7, %c0_8], %12 {strides = array<i32>} : memref<1x4x256xf32, #tpu.memory_space<vmem>>, vector<1x4x256xf32>,
    return
  }
  func.func @transform_0(%arg0: i32) -> (i32, i32, i32) {
    %c0_i32 = arith.constant 0 : i32
    %c0_i32_0 = arith.constant 0 : i32
    %c0_i32_1 = arith.constant 0 : i32
    return %arg0, %c0_i32, %c0_i32_0 : i32, i32, i32
  }
  func.func @transform_1(%arg0: i32) -> (i32, i32) {
    %c0_i32 = arith.constant 0 : i32
    %c0_i32_0 = arith.constant 0 : i32
    %c0_i32_1 = arith.constant 0 : i32
    return %c0_i32, %c0_i32_0 : i32, i32
  }
  func.func @transform_2(%arg0: i32) -> (i32, i32) {
    %c0_i32 = arith.constant 0 : i32
    %c0_i32_0 = arith.constant 0 : i32
    %c0_i32_1 = arith.constant 0 : i32
    return %c0_i32, %c0_i32_0 : i32, i32
  }
  func.func @transform_3(%arg0: i32) -> (i32, i32, i32) {
    %c0_i32 = arith.constant 0 : i32
    %c0_i32_0 = arith.constant 0 : i32
    %c0_i32_1 = arith.constant 0 : i32
    return %arg0, %c0_i32, %c0_i32_0 : i32, i32, i32
  }
}

module attributes {stable_mosaic.version = 11 : i64} {
  func.func @_conv2_kernel(%arg0: i32, %arg1: memref<1x4x288xbf16, #tpu.memory_space<vmem>>, %arg2: memref<4x1xf32, #tpu.memory_space<vmem>>, %arg3: memref<4x1xf32, #tpu.memory_space<vmem>>, %arg4: memref<4x36xbf16, #tpu.memory_space<vmem>>, %arg5: memref<288x256xf32, #tpu.memory_space<vmem>>, %arg6: memref<1x4x256xf32, #tpu.memory_space<vmem>>, %arg7: memref<1x4x1xf32, #tpu.memory_space<vmem>>, %arg8: memref<1x4x1xf32, #tpu.memory_space<vmem>>, %arg9: memref<4x326xbf16, #tpu.memory_space<vmem>>, %arg10: memref<36x288xbf16, #tpu.memory_space<vmem>>) attributes {dimension_semantics = [#tpu.dimension_semantics<parallel>], iteration_bounds = array<i64: 2>, scalar_prefetch = 0 : i64, scratch_operands = 2 : i64, tpu.core_type = #tpu.core_type<tc>, window_params = [{transform_indices = @transform_0, window_bounds = array<i64: 1, 4, 288>}, {pipeline_mode = #tpu.pipeline_mode<synchronous>, transform_indices = @transform_1, window_bounds = array<i64: 4, 1>}, {pipeline_mode = #tpu.pipeline_mode<synchronous>, transform_indices = @transform_2, window_bounds = array<i64: 4, 1>}, {pipeline_mode = #tpu.pipeline_mode<synchronous>, transform_indices = @transform_3, window_bounds = array<i64: 4, 36>}, {pipeline_mode = #tpu.pipeline_mode<synchronous>, transform_indices = @transform_4, window_bounds = array<i64: 288, 256>}, {transform_indices = @transform_5, window_bounds = array<i64: 1, 4, 256>}, {transform_indices = @transform_6, window_bounds = array<i64: 1, 4, 1>}, {transform_indices = @transform_7, window_bounds = array<i64: 1, 4, 1>}]} {
    %c0 = arith.constant 0 : index
    %c0_0 = arith.constant 0 : index
    %c0_1 = arith.constant 0 : index
    %0 = vector.load %arg1[%c0, %c0_0, %c0_1] : memref<1x4x288xbf16, #tpu.memory_space<vmem>>, vector<1x4x288xbf16>
    %1 = vector.shape_cast %0 : vector<1x4x288xbf16> to vector<4x288xbf16>
    %2 = arith.extf %1 : vector<4x288xbf16> to vector<4x288xf32>
    %c0_2 = arith.constant 0 : index
    %c0_3 = arith.constant 0 : index
    %3 = vector.load %arg2[%c0_2, %c0_3] : memref<4x1xf32, #tpu.memory_space<vmem>>, vector<4x1xf32>
    %4 = vector.broadcast %3 : vector<4x1xf32> to vector<4x288xf32>
    %5 = arith.mulf %2, %4 : vector<4x288xf32>
    %c0_4 = arith.constant 0 : index
    %c0_5 = arith.constant 0 : index
    %6 = vector.load %arg3[%c0_4, %c0_5] : memref<4x1xf32, #tpu.memory_space<vmem>>, vector<4x1xf32>
    %7 = vector.broadcast %6 : vector<4x1xf32> to vector<4x288xf32>
    %8 = arith.addf %5, %7 : vector<4x288xf32>
    %cst = arith.constant 0.000000e+00 : f32
    %9 = vector.broadcast %cst : f32 to vector<4x288xf32>
    %10 = arith.maximumf %8, %9 : vector<4x288xf32>
    %11 = tpu.iota {dimensions = array<i32: 1>} : vector<1x288xi32>
    %c18_i32 = arith.constant 18 : i32
    %c0_i32 = arith.constant 0 : i32
    %12 = arith.cmpi eq, %c18_i32, %c0_i32 : i32
    %c1_i32 = arith.constant 1 : i32
    %13 = arith.select %12, %c1_i32, %c18_i32 : i32
    %14 = vector.broadcast %13 : i32 to vector<1x288xi32>
    %15 = arith.remsi %11, %14 : vector<1x288xi32>
    %c0_i32_6 = arith.constant 0 : i32
    %16 = vector.broadcast %c0_i32_6 : i32 to vector<1x288xi32>
    %17 = arith.cmpi ne, %15, %16 : vector<1x288xi32>
    %c0_i32_7 = arith.constant 0 : i32
    %18 = vector.broadcast %c0_i32_7 : i32 to vector<1x288xi32>
    %19 = arith.cmpi slt, %15, %18 : vector<1x288xi32>
    %c0_i32_8 = arith.constant 0 : i32
    %20 = arith.cmpi slt, %13, %c0_i32_8 : i32
    %21 = vector.broadcast %20 : i1 to vector<1x288xi1>
    %22 = vector.broadcast %21 : vector<1x288xi1> to vector<1x288xi1>
    %23 = arith.xori %19, %22 : vector<1x288xi1>
    %24 = arith.andi %23, %17 : vector<1x288xi1>
    %25 = vector.broadcast %13 : i32 to vector<1x288xi32>
    %26 = arith.addi %15, %25 : vector<1x288xi32>
    %27 = arith.select %24, %26, %15 : vector<1x288xi1>, vector<1x288xi32>
    %c16_i32 = arith.constant 16 : i32
    %28 = vector.broadcast %c16_i32 : i32 to vector<1x288xi32>
    %29 = arith.cmpi slt, %27, %28 : vector<1x288xi32>
    %cst_9 = arith.constant 0.000000e+00 : f32
    %30 = vector.shape_cast %29 : vector<1x288xi1> to vector<1x288xi1>
    %31 = vector.broadcast %30 : vector<1x288xi1> to vector<4x288xi1>
    %32 = vector.broadcast %cst_9 : f32 to vector<4x288xf32>
    %33 = arith.select %31, %10, %32 : vector<4x288xi1>, vector<4x288xf32>
    %cst_10 = arith.constant 0.000000e+00 : bf16
    %34 = vector.broadcast %cst_10 : bf16 to vector<4x326xbf16>
    %c0_11 = arith.constant 0 : index
    %c0_12 = arith.constant 0 : index
    %35 = vector.load %arg9[%c0_11, %c0_12] : memref<4x326xbf16, #tpu.memory_space<vmem>>, vector<4x326xbf16>
    tpu.vector_store %arg9[%c0_11, %c0_12], %34 {strides = array<i32>} : memref<4x326xbf16, #tpu.memory_space<vmem>>, vector<4x326xbf16>,
    %36 = arith.truncf %33 : vector<4x288xf32> to vector<4x288xbf16>
    %c0_13 = arith.constant 0 : index
    %c19 = arith.constant 19 : index
    %37 = vector.load %arg9[%c0_13, %c19] : memref<4x326xbf16, #tpu.memory_space<vmem>>, vector<4x288xbf16>
    tpu.vector_store %arg9[%c0_13, %c19], %36 {strides = array<i32>} : memref<4x326xbf16, #tpu.memory_space<vmem>>, vector<4x288xbf16>,
    %c0_14 = arith.constant 0 : index
    %c0_15 = arith.constant 0 : index
    %38 = vector.load %arg9[%c0_14, %c0_15] : memref<4x326xbf16, #tpu.memory_space<vmem>>, vector<4x288xbf16>
    %c0_16 = arith.constant 0 : index
    %c0_17 = arith.constant 0 : index
    %39 = vector.load %arg10[%c0_16, %c0_17] : memref<36x288xbf16, #tpu.memory_space<vmem>>, vector<4x288xbf16>
    tpu.vector_store %arg10[%c0_16, %c0_17], %38 {strides = array<i32>} : memref<36x288xbf16, #tpu.memory_space<vmem>>, vector<4x288xbf16>,
    %c0_18 = arith.constant 0 : index
    %c1 = arith.constant 1 : index
    %40 = vector.load %arg9[%c0_18, %c1] : memref<4x326xbf16, #tpu.memory_space<vmem>>, vector<4x288xbf16>
    %c4 = arith.constant 4 : index
    %c0_19 = arith.constant 0 : index
    %41 = vector.load %arg10[%c4, %c0_19] : memref<36x288xbf16, #tpu.memory_space<vmem>>, vector<4x288xbf16>
    tpu.vector_store %arg10[%c4, %c0_19], %40 {strides = array<i32>} : memref<36x288xbf16, #tpu.memory_space<vmem>>, vector<4x288xbf16>,
    %c0_20 = arith.constant 0 : index
    %c2 = arith.constant 2 : index
    %42 = vector.load %arg9[%c0_20, %c2] : memref<4x326xbf16, #tpu.memory_space<vmem>>, vector<4x288xbf16>
    %c8 = arith.constant 8 : index
    %c0_21 = arith.constant 0 : index
    %43 = vector.load %arg10[%c8, %c0_21] : memref<36x288xbf16, #tpu.memory_space<vmem>>, vector<4x288xbf16>
    tpu.vector_store %arg10[%c8, %c0_21], %42 {strides = array<i32>} : memref<36x288xbf16, #tpu.memory_space<vmem>>, vector<4x288xbf16>,
    %c0_22 = arith.constant 0 : index
    %c18 = arith.constant 18 : index
    %44 = vector.load %arg9[%c0_22, %c18] : memref<4x326xbf16, #tpu.memory_space<vmem>>, vector<4x288xbf16>
    %c12 = arith.constant 12 : index
    %c0_23 = arith.constant 0 : index
    %45 = vector.load %arg10[%c12, %c0_23] : memref<36x288xbf16, #tpu.memory_space<vmem>>, vector<4x288xbf16>
    tpu.vector_store %arg10[%c12, %c0_23], %44 {strides = array<i32>} : memref<36x288xbf16, #tpu.memory_space<vmem>>, vector<4x288xbf16>,
    %c0_24 = arith.constant 0 : index
    %c19_25 = arith.constant 19 : index
    %46 = vector.load %arg9[%c0_24, %c19_25] : memref<4x326xbf16, #tpu.memory_space<vmem>>, vector<4x288xbf16>
    %c16 = arith.constant 16 : index
    %c0_26 = arith.constant 0 : index
    %47 = vector.load %arg10[%c16, %c0_26] : memref<36x288xbf16, #tpu.memory_space<vmem>>, vector<4x288xbf16>
    tpu.vector_store %arg10[%c16, %c0_26], %46 {strides = array<i32>} : memref<36x288xbf16, #tpu.memory_space<vmem>>, vector<4x288xbf16>,
    %c0_27 = arith.constant 0 : index
    %c20 = arith.constant 20 : index
    %48 = vector.load %arg9[%c0_27, %c20] : memref<4x326xbf16, #tpu.memory_space<vmem>>, vector<4x288xbf16>
    %c20_28 = arith.constant 20 : index
    %c0_29 = arith.constant 0 : index
    %49 = vector.load %arg10[%c20_28, %c0_29] : memref<36x288xbf16, #tpu.memory_space<vmem>>, vector<4x288xbf16>
    tpu.vector_store %arg10[%c20_28, %c0_29], %48 {strides = array<i32>} : memref<36x288xbf16, #tpu.memory_space<vmem>>, vector<4x288xbf16>,
    %c0_30 = arith.constant 0 : index
    %c36 = arith.constant 36 : index
    %50 = vector.load %arg9[%c0_30, %c36] : memref<4x326xbf16, #tpu.memory_space<vmem>>, vector<4x288xbf16>
    %c24 = arith.constant 24 : index
    %c0_31 = arith.constant 0 : index
    %51 = vector.load %arg10[%c24, %c0_31] : memref<36x288xbf16, #tpu.memory_space<vmem>>, vector<4x288xbf16>
    tpu.vector_store %arg10[%c24, %c0_31], %50 {strides = array<i32>} : memref<36x288xbf16, #tpu.memory_space<vmem>>, vector<4x288xbf16>,
    %c0_32 = arith.constant 0 : index
    %c37 = arith.constant 37 : index
    %52 = vector.load %arg9[%c0_32, %c37] : memref<4x326xbf16, #tpu.memory_space<vmem>>, vector<4x288xbf16>
    %c28 = arith.constant 28 : index
    %c0_33 = arith.constant 0 : index
    %53 = vector.load %arg10[%c28, %c0_33] : memref<36x288xbf16, #tpu.memory_space<vmem>>, vector<4x288xbf16>
    tpu.vector_store %arg10[%c28, %c0_33], %52 {strides = array<i32>} : memref<36x288xbf16, #tpu.memory_space<vmem>>, vector<4x288xbf16>,
    %c0_34 = arith.constant 0 : index
    %c38 = arith.constant 38 : index
    %54 = vector.load %arg9[%c0_34, %c38] : memref<4x326xbf16, #tpu.memory_space<vmem>>, vector<4x288xbf16>
    %c32 = arith.constant 32 : index
    %c0_35 = arith.constant 0 : index
    %55 = vector.load %arg10[%c32, %c0_35] : memref<36x288xbf16, #tpu.memory_space<vmem>>, vector<4x288xbf16>
    tpu.vector_store %arg10[%c32, %c0_35], %54 {strides = array<i32>} : memref<36x288xbf16, #tpu.memory_space<vmem>>, vector<4x288xbf16>,
    %c0_36 = arith.constant 0 : index
    %c0_37 = arith.constant 0 : index
    %56 = vector.load %arg4[%c0_36, %c0_37] : memref<4x36xbf16, #tpu.memory_space<vmem>>, vector<4x36xbf16>
    %c0_38 = arith.constant 0 : index
    %c0_39 = arith.constant 0 : index
    %57 = vector.load %arg10[%c0_38, %c0_39] : memref<36x288xbf16, #tpu.memory_space<vmem>>, vector<36x288xbf16>
    %cst_40 = arith.constant dense<0.000000e+00> : vector<4x288xf32>
    %58 = tpu.matmul %56, %57, %cst_40 {dimension_numbers = #tpu.dot_dimension_numbers<[1], [0], [0], [1], [0, 0, 1, 1], [], []>} : vector<4x36xbf16>, vector<36x288xbf16>, vector<4x288xf32> -> vector<4x288xf32>
    %c0_41 = arith.constant 0 : index
    %c0_42 = arith.constant 0 : index
    %59 = vector.load %arg5[%c0_41, %c0_42] : memref<288x256xf32, #tpu.memory_space<vmem>>, vector<288x256xf32>
    %cst_43 = arith.constant dense<0.000000e+00> : vector<4x256xf32>
    %60 = tpu.matmul %58, %59, %cst_43 {dimension_numbers = #tpu.dot_dimension_numbers<[1], [0], [0], [1], [0, 0, 1, 1], [], []>} : vector<4x288xf32>, vector<288x256xf32>, vector<4x256xf32> -> vector<4x256xf32>
    %cst_44 = arith.constant dense<0.000000e+00> : vector<4xf32>
    %61 = vector.multi_reduction <add>, %60, %cst_44 [1] : vector<4x256xf32> to vector<4xf32>
    %62 = vector.shape_cast %61 : vector<4xf32> to vector<4x1xf32>
    %c0_45 = arith.constant 0 : index
    %c0_46 = arith.constant 0 : index
    %c0_47 = arith.constant 0 : index
    %63 = vector.load %arg7[%c0_45, %c0_46, %c0_47] : memref<1x4x1xf32, #tpu.memory_space<vmem>>, vector<1x4x1xf32>
    %64 = vector.shape_cast %63 : vector<1x4x1xf32> to vector<4x1xf32>
    %65 = vector.shape_cast %62 : vector<4x1xf32> to vector<1x4x1xf32>
    tpu.vector_store %arg7[%c0_45, %c0_46, %c0_47], %65 {strides = array<i32>} : memref<1x4x1xf32, #tpu.memory_space<vmem>>, vector<1x4x1xf32>,
    %66 = arith.mulf %60, %60 : vector<4x256xf32>
    %cst_48 = arith.constant dense<0.000000e+00> : vector<4xf32>
    %67 = vector.multi_reduction <add>, %66, %cst_48 [1] : vector<4x256xf32> to vector<4xf32>
    %68 = vector.shape_cast %67 : vector<4xf32> to vector<4x1xf32>
    %c0_49 = arith.constant 0 : index
    %c0_50 = arith.constant 0 : index
    %c0_51 = arith.constant 0 : index
    %69 = vector.load %arg8[%c0_49, %c0_50, %c0_51] : memref<1x4x1xf32, #tpu.memory_space<vmem>>, vector<1x4x1xf32>
    %70 = vector.shape_cast %69 : vector<1x4x1xf32> to vector<4x1xf32>
    %71 = vector.shape_cast %68 : vector<4x1xf32> to vector<1x4x1xf32>
    tpu.vector_store %arg8[%c0_49, %c0_50, %c0_51], %71 {strides = array<i32>} : memref<1x4x1xf32, #tpu.memory_space<vmem>>, vector<1x4x1xf32>,
    %c0_52 = arith.constant 0 : index
    %c0_53 = arith.constant 0 : index
    %c0_54 = arith.constant 0 : index
    %72 = vector.load %arg6[%c0_52, %c0_53, %c0_54] : memref<1x4x256xf32, #tpu.memory_space<vmem>>, vector<1x4x256xf32>
    %73 = vector.shape_cast %72 : vector<1x4x256xf32> to vector<4x256xf32>
    %74 = vector.shape_cast %60 : vector<4x256xf32> to vector<1x4x256xf32>
    tpu.vector_store %arg6[%c0_52, %c0_53, %c0_54], %74 {strides = array<i32>} : memref<1x4x256xf32, #tpu.memory_space<vmem>>, vector<1x4x256xf32>,
    return
  }
  func.func @transform_0(%arg0: i32) -> (i32, i32, i32) {
    %c0_i32 = arith.constant 0 : i32
    %c0_i32_0 = arith.constant 0 : i32
    %c0_i32_1 = arith.constant 0 : i32
    return %arg0, %c0_i32, %c0_i32_0 : i32, i32, i32
  }
  func.func @transform_1(%arg0: i32) -> (i32, i32) {
    %c0_i32 = arith.constant 0 : i32
    %c0_i32_0 = arith.constant 0 : i32
    %c0_i32_1 = arith.constant 0 : i32
    return %c0_i32, %c0_i32_0 : i32, i32
  }
  func.func @transform_2(%arg0: i32) -> (i32, i32) {
    %c0_i32 = arith.constant 0 : i32
    %c0_i32_0 = arith.constant 0 : i32
    %c0_i32_1 = arith.constant 0 : i32
    return %c0_i32, %c0_i32_0 : i32, i32
  }
  func.func @transform_3(%arg0: i32) -> (i32, i32) {
    %c0_i32 = arith.constant 0 : i32
    %c0_i32_0 = arith.constant 0 : i32
    %c0_i32_1 = arith.constant 0 : i32
    return %c0_i32, %c0_i32_0 : i32, i32
  }
  func.func @transform_4(%arg0: i32) -> (i32, i32) {
    %c0_i32 = arith.constant 0 : i32
    %c0_i32_0 = arith.constant 0 : i32
    %c0_i32_1 = arith.constant 0 : i32
    return %c0_i32, %c0_i32_0 : i32, i32
  }
  func.func @transform_5(%arg0: i32) -> (i32, i32, i32) {
    %c0_i32 = arith.constant 0 : i32
    %c0_i32_0 = arith.constant 0 : i32
    %c0_i32_1 = arith.constant 0 : i32
    return %arg0, %c0_i32, %c0_i32_0 : i32, i32, i32
  }
  func.func @transform_6(%arg0: i32) -> (i32, i32, i32) {
    %c0_i32 = arith.constant 0 : i32
    %c0_i32_0 = arith.constant 0 : i32
    %c0_i32_1 = arith.constant 0 : i32
    return %arg0, %c0_i32, %c0_i32_0 : i32, i32, i32
  }
  func.func @transform_7(%arg0: i32) -> (i32, i32, i32) {
    %c0_i32 = arith.constant 0 : i32
    %c0_i32_0 = arith.constant 0 : i32
    %c0_i32_1 = arith.constant 0 : i32
    return %arg0, %c0_i32, %c0_i32_0 : i32, i32, i32
  }
}

module attributes {stable_mosaic.version = 11 : i64} {
  func.func @_conv1_kernel(%arg0: i32, %arg1: memref<1x4x326xbf16, #tpu.memory_space<vmem>>, %arg2: memref<4x36xbf16, #tpu.memory_space<vmem>>, %arg3: memref<1x4x288xbf16, #tpu.memory_space<vmem>>, %arg4: memref<1x4x1xf32, #tpu.memory_space<vmem>>, %arg5: memref<1x4x1xf32, #tpu.memory_space<vmem>>, %arg6: memref<36x288xbf16, #tpu.memory_space<vmem>>) attributes {dimension_semantics = [#tpu.dimension_semantics<parallel>], iteration_bounds = array<i64: 2>, scalar_prefetch = 0 : i64, scratch_operands = 1 : i64, tpu.core_type = #tpu.core_type<tc>, window_params = [{transform_indices = @transform_0, window_bounds = array<i64: 1, 4, 326>}, {pipeline_mode = #tpu.pipeline_mode<synchronous>, transform_indices = @transform_1, window_bounds = array<i64: 4, 36>}, {transform_indices = @transform_2, window_bounds = array<i64: 1, 4, 288>}, {transform_indices = @transform_3, window_bounds = array<i64: 1, 4, 1>}, {transform_indices = @transform_4, window_bounds = array<i64: 1, 4, 1>}]} {
    %c0 = arith.constant 0 : index
    %c0_0 = arith.constant 0 : index
    %c0_1 = arith.constant 0 : index
    %0 = vector.load %arg1[%c0, %c0_0, %c0_1] : memref<1x4x326xbf16, #tpu.memory_space<vmem>>, vector<1x4x288xbf16>
    %1 = vector.shape_cast %0 : vector<1x4x288xbf16> to vector<4x288xbf16>
    %c0_2 = arith.constant 0 : index
    %c0_3 = arith.constant 0 : index
    %2 = vector.load %arg6[%c0_2, %c0_3] : memref<36x288xbf16, #tpu.memory_space<vmem>>, vector<4x288xbf16>
    tpu.vector_store %arg6[%c0_2, %c0_3], %1 {strides = array<i32>} : memref<36x288xbf16, #tpu.memory_space<vmem>>, vector<4x288xbf16>,
    %c0_4 = arith.constant 0 : index
    %c0_5 = arith.constant 0 : index
    %c1 = arith.constant 1 : index
    %3 = vector.load %arg1[%c0_4, %c0_5, %c1] : memref<1x4x326xbf16, #tpu.memory_space<vmem>>, vector<1x4x288xbf16>
    %4 = vector.shape_cast %3 : vector<1x4x288xbf16> to vector<4x288xbf16>
    %c4 = arith.constant 4 : index
    %c0_6 = arith.constant 0 : index
    %5 = vector.load %arg6[%c4, %c0_6] : memref<36x288xbf16, #tpu.memory_space<vmem>>, vector<4x288xbf16>
    tpu.vector_store %arg6[%c4, %c0_6], %4 {strides = array<i32>} : memref<36x288xbf16, #tpu.memory_space<vmem>>, vector<4x288xbf16>,
    %c0_7 = arith.constant 0 : index
    %c0_8 = arith.constant 0 : index
    %c2 = arith.constant 2 : index
    %6 = vector.load %arg1[%c0_7, %c0_8, %c2] : memref<1x4x326xbf16, #tpu.memory_space<vmem>>, vector<1x4x288xbf16>
    %7 = vector.shape_cast %6 : vector<1x4x288xbf16> to vector<4x288xbf16>
    %c8 = arith.constant 8 : index
    %c0_9 = arith.constant 0 : index
    %8 = vector.load %arg6[%c8, %c0_9] : memref<36x288xbf16, #tpu.memory_space<vmem>>, vector<4x288xbf16>
    tpu.vector_store %arg6[%c8, %c0_9], %7 {strides = array<i32>} : memref<36x288xbf16, #tpu.memory_space<vmem>>, vector<4x288xbf16>,
    %c0_10 = arith.constant 0 : index
    %c0_11 = arith.constant 0 : index
    %c18 = arith.constant 18 : index
    %9 = vector.load %arg1[%c0_10, %c0_11, %c18] : memref<1x4x326xbf16, #tpu.memory_space<vmem>>, vector<1x4x288xbf16>
    %10 = vector.shape_cast %9 : vector<1x4x288xbf16> to vector<4x288xbf16>
    %c12 = arith.constant 12 : index
    %c0_12 = arith.constant 0 : index
    %11 = vector.load %arg6[%c12, %c0_12] : memref<36x288xbf16, #tpu.memory_space<vmem>>, vector<4x288xbf16>
    tpu.vector_store %arg6[%c12, %c0_12], %10 {strides = array<i32>} : memref<36x288xbf16, #tpu.memory_space<vmem>>, vector<4x288xbf16>,
    %c0_13 = arith.constant 0 : index
    %c0_14 = arith.constant 0 : index
    %c19 = arith.constant 19 : index
    %12 = vector.load %arg1[%c0_13, %c0_14, %c19] : memref<1x4x326xbf16, #tpu.memory_space<vmem>>, vector<1x4x288xbf16>
    %13 = vector.shape_cast %12 : vector<1x4x288xbf16> to vector<4x288xbf16>
    %c16 = arith.constant 16 : index
    %c0_15 = arith.constant 0 : index
    %14 = vector.load %arg6[%c16, %c0_15] : memref<36x288xbf16, #tpu.memory_space<vmem>>, vector<4x288xbf16>
    tpu.vector_store %arg6[%c16, %c0_15], %13 {strides = array<i32>} : memref<36x288xbf16, #tpu.memory_space<vmem>>, vector<4x288xbf16>,
    %c0_16 = arith.constant 0 : index
    %c0_17 = arith.constant 0 : index
    %c20 = arith.constant 20 : index
    %15 = vector.load %arg1[%c0_16, %c0_17, %c20] : memref<1x4x326xbf16, #tpu.memory_space<vmem>>, vector<1x4x288xbf16>
    %16 = vector.shape_cast %15 : vector<1x4x288xbf16> to vector<4x288xbf16>
    %c20_18 = arith.constant 20 : index
    %c0_19 = arith.constant 0 : index
    %17 = vector.load %arg6[%c20_18, %c0_19] : memref<36x288xbf16, #tpu.memory_space<vmem>>, vector<4x288xbf16>
    tpu.vector_store %arg6[%c20_18, %c0_19], %16 {strides = array<i32>} : memref<36x288xbf16, #tpu.memory_space<vmem>>, vector<4x288xbf16>,
    %c0_20 = arith.constant 0 : index
    %c0_21 = arith.constant 0 : index
    %c36 = arith.constant 36 : index
    %18 = vector.load %arg1[%c0_20, %c0_21, %c36] : memref<1x4x326xbf16, #tpu.memory_space<vmem>>, vector<1x4x288xbf16>
    %19 = vector.shape_cast %18 : vector<1x4x288xbf16> to vector<4x288xbf16>
    %c24 = arith.constant 24 : index
    %c0_22 = arith.constant 0 : index
    %20 = vector.load %arg6[%c24, %c0_22] : memref<36x288xbf16, #tpu.memory_space<vmem>>, vector<4x288xbf16>
    tpu.vector_store %arg6[%c24, %c0_22], %19 {strides = array<i32>} : memref<36x288xbf16, #tpu.memory_space<vmem>>, vector<4x288xbf16>,
    %c0_23 = arith.constant 0 : index
    %c0_24 = arith.constant 0 : index
    %c37 = arith.constant 37 : index
    %21 = vector.load %arg1[%c0_23, %c0_24, %c37] : memref<1x4x326xbf16, #tpu.memory_space<vmem>>, vector<1x4x288xbf16>
    %22 = vector.shape_cast %21 : vector<1x4x288xbf16> to vector<4x288xbf16>
    %c28 = arith.constant 28 : index
    %c0_25 = arith.constant 0 : index
    %23 = vector.load %arg6[%c28, %c0_25] : memref<36x288xbf16, #tpu.memory_space<vmem>>, vector<4x288xbf16>
    tpu.vector_store %arg6[%c28, %c0_25], %22 {strides = array<i32>} : memref<36x288xbf16, #tpu.memory_space<vmem>>, vector<4x288xbf16>,
    %c0_26 = arith.constant 0 : index
    %c0_27 = arith.constant 0 : index
    %c38 = arith.constant 38 : index
    %24 = vector.load %arg1[%c0_26, %c0_27, %c38] : memref<1x4x326xbf16, #tpu.memory_space<vmem>>, vector<1x4x288xbf16>
    %25 = vector.shape_cast %24 : vector<1x4x288xbf16> to vector<4x288xbf16>
    %c32 = arith.constant 32 : index
    %c0_28 = arith.constant 0 : index
    %26 = vector.load %arg6[%c32, %c0_28] : memref<36x288xbf16, #tpu.memory_space<vmem>>, vector<4x288xbf16>
    tpu.vector_store %arg6[%c32, %c0_28], %25 {strides = array<i32>} : memref<36x288xbf16, #tpu.memory_space<vmem>>, vector<4x288xbf16>,
    %c0_29 = arith.constant 0 : index
    %c0_30 = arith.constant 0 : index
    %27 = vector.load %arg2[%c0_29, %c0_30] : memref<4x36xbf16, #tpu.memory_space<vmem>>, vector<4x36xbf16>
    %c0_31 = arith.constant 0 : index
    %c0_32 = arith.constant 0 : index
    %28 = vector.load %arg6[%c0_31, %c0_32] : memref<36x288xbf16, #tpu.memory_space<vmem>>, vector<36x288xbf16>
    %cst = arith.constant dense<0.000000e+00> : vector<4x288xf32>
    %29 = tpu.matmul %27, %28, %cst {dimension_numbers = #tpu.dot_dimension_numbers<[1], [0], [0], [1], [0, 0, 1, 1], [], []>} : vector<4x36xbf16>, vector<36x288xbf16>, vector<4x288xf32> -> vector<4x288xf32>
    %30 = tpu.iota {dimensions = array<i32: 1>} : vector<1x288xi32>
    %c18_i32 = arith.constant 18 : i32
    %c0_i32 = arith.constant 0 : i32
    %31 = arith.cmpi eq, %c18_i32, %c0_i32 : i32
    %c1_i32 = arith.constant 1 : i32
    %32 = arith.select %31, %c1_i32, %c18_i32 : i32
    %33 = vector.broadcast %32 : i32 to vector<1x288xi32>
    %34 = arith.remsi %30, %33 : vector<1x288xi32>
    %c0_i32_33 = arith.constant 0 : i32
    %35 = vector.broadcast %c0_i32_33 : i32 to vector<1x288xi32>
    %36 = arith.cmpi ne, %34, %35 : vector<1x288xi32>
    %c0_i32_34 = arith.constant 0 : i32
    %37 = vector.broadcast %c0_i32_34 : i32 to vector<1x288xi32>
    %38 = arith.cmpi slt, %34, %37 : vector<1x288xi32>
    %c0_i32_35 = arith.constant 0 : i32
    %39 = arith.cmpi slt, %32, %c0_i32_35 : i32
    %40 = vector.broadcast %39 : i1 to vector<1x288xi1>
    %41 = vector.broadcast %40 : vector<1x288xi1> to vector<1x288xi1>
    %42 = arith.xori %38, %41 : vector<1x288xi1>
    %43 = arith.andi %42, %36 : vector<1x288xi1>
    %44 = vector.broadcast %32 : i32 to vector<1x288xi32>
    %45 = arith.addi %34, %44 : vector<1x288xi32>
    %46 = arith.select %43, %45, %34 : vector<1x288xi1>, vector<1x288xi32>
    %c16_i32 = arith.constant 16 : i32
    %47 = vector.broadcast %c16_i32 : i32 to vector<1x288xi32>
    %48 = arith.cmpi slt, %46, %47 : vector<1x288xi32>
    %cst_36 = arith.constant 0.000000e+00 : f32
    %49 = vector.shape_cast %48 : vector<1x288xi1> to vector<1x288xi1>
    %50 = vector.broadcast %49 : vector<1x288xi1> to vector<4x288xi1>
    %51 = vector.broadcast %cst_36 : f32 to vector<4x288xf32>
    %52 = arith.select %50, %29, %51 : vector<4x288xi1>, vector<4x288xf32>
    %cst_37 = arith.constant dense<0.000000e+00> : vector<4xf32>
    %53 = vector.multi_reduction <add>, %52, %cst_37 [1] : vector<4x288xf32> to vector<4xf32>
    %54 = vector.shape_cast %53 : vector<4xf32> to vector<4x1xf32>
    %c0_38 = arith.constant 0 : index
    %c0_39 = arith.constant 0 : index
    %c0_40 = arith.constant 0 : index
    %55 = vector.load %arg4[%c0_38, %c0_39, %c0_40] : memref<1x4x1xf32, #tpu.memory_space<vmem>>, vector<1x4x1xf32>
    %56 = vector.shape_cast %55 : vector<1x4x1xf32> to vector<4x1xf32>
    %57 = vector.shape_cast %54 : vector<4x1xf32> to vector<1x4x1xf32>
    tpu.vector_store %arg4[%c0_38, %c0_39, %c0_40], %57 {strides = array<i32>} : memref<1x4x1xf32, #tpu.memory_space<vmem>>, vector<1x4x1xf32>,
    %58 = arith.mulf %52, %29 : vector<4x288xf32>
    %cst_41 = arith.constant dense<0.000000e+00> : vector<4xf32>
    %59 = vector.multi_reduction <add>, %58, %cst_41 [1] : vector<4x288xf32> to vector<4xf32>
    %60 = vector.shape_cast %59 : vector<4xf32> to vector<4x1xf32>
    %c0_42 = arith.constant 0 : index
    %c0_43 = arith.constant 0 : index
    %c0_44 = arith.constant 0 : index
    %61 = vector.load %arg5[%c0_42, %c0_43, %c0_44] : memref<1x4x1xf32, #tpu.memory_space<vmem>>, vector<1x4x1xf32>
    %62 = vector.shape_cast %61 : vector<1x4x1xf32> to vector<4x1xf32>
    %63 = vector.shape_cast %60 : vector<4x1xf32> to vector<1x4x1xf32>
    tpu.vector_store %arg5[%c0_42, %c0_43, %c0_44], %63 {strides = array<i32>} : memref<1x4x1xf32, #tpu.memory_space<vmem>>, vector<1x4x1xf32>,
    %64 = arith.truncf %29 : vector<4x288xf32> to vector<4x288xbf16>
    %c0_45 = arith.constant 0 : index
    %c0_46 = arith.constant 0 : index
    %c0_47 = arith.constant 0 : index
    %65 = vector.load %arg3[%c0_45, %c0_46, %c0_47] : memref<1x4x288xbf16, #tpu.memory_space<vmem>>, vector<1x4x288xbf16>
    %66 = vector.shape_cast %65 : vector<1x4x288xbf16> to vector<4x288xbf16>
    %67 = vector.shape_cast %64 : vector<4x288xbf16> to vector<1x4x288xbf16>
    tpu.vector_store %arg3[%c0_45, %c0_46, %c0_47], %67 {strides = array<i32>} : memref<1x4x288xbf16, #tpu.memory_space<vmem>>, vector<1x4x288xbf16>,
    return
  }
  func.func @transform_0(%arg0: i32) -> (i32, i32, i32) {
    %c0_i32 = arith.constant 0 : i32
    %c0_i32_0 = arith.constant 0 : i32
    %c0_i32_1 = arith.constant 0 : i32
    return %arg0, %c0_i32, %c0_i32_0 : i32, i32, i32
  }
  func.func @transform_1(%arg0: i32) -> (i32, i32) {
    %c0_i32 = arith.constant 0 : i32
    %c0_i32_0 = arith.constant 0 : i32
    %c0_i32_1 = arith.constant 0 : i32
    return %c0_i32, %c0_i32_0 : i32, i32
  }
  func.func @transform_2(%arg0: i32) -> (i32, i32, i32) {
    %c0_i32 = arith.constant 0 : i32
    %c0_i32_0 = arith.constant 0 : i32
    %c0_i32_1 = arith.constant 0 : i32
    return %arg0, %c0_i32, %c0_i32_0 : i32, i32, i32
  }
  func.func @transform_3(%arg0: i32) -> (i32, i32, i32) {
    %c0_i32 = arith.constant 0 : i32
    %c0_i32_0 = arith.constant 0 : i32
    %c0_i32_1 = arith.constant 0 : i32
    return %arg0, %c0_i32, %c0_i32_0 : i32, i32, i32
  }
  func.func @transform_4(%arg0: i32) -> (i32, i32, i32) {
    %c0_i32 = arith.constant 0 : i32
    %c0_i32_0 = arith.constant 0 : i32
    %c0_i32_1 = arith.constant 0 : i32
    return %arg0, %c0_i32, %c0_i32_0 : i32, i32, i32
  }
}

</mosaic_0001>

<bundles_post_ra>
// kernel: resnet_block.5
= control target key start
LH: loop header
LB: loop body
LE: loop exit
PB: predicated region body
PF: predicated region fallthrough
CT: control target
= control target key end

     0   :  { %s311_s12 = smov 0   ;;  %s334_s0 = inlined_call_operand.vmem [shape: f32[2,4,256], index: 0, kind: input, shape index: {}]   ;;  %s335_s1 = inlined_call_operand.vmem [shape: f32[4,1], index: 1, kind: input, shape index: {}]   ;;  %s336_s2 = inlined_call_operand.vmem [shape: f32[4,1], index: 2, kind: input, shape index: {}]   ;;  %s337_s3 = inlined_call_operand.vmem [shape: f32[2,4,256], index: 3, kind: output, shape index: {}]  }
   0x1 LB: > { %s257_s13 = sadd.s32 4294967295, %s287_s12   ;;  %p261_p0 = scmp.ge.s32.totalorder %s287_s12, 1  ;;  %s287_s12 = sphi %s311_s12, %s13_s12  }
   0x2   : > { %p137_p1 = scmp.lt.s32.totalorder %s287_s12, 3 }
   0x4   : > { %p138_p2 = pnand %p261_p0, %p137_p1 }
   0x5   : > { %v172_v0 = vld [vmem:[%s335_s1] sm:$0xf] (!%p138_p2)  ;;  %v289_v1 = vmov (!%p138_p2), 0   ;;  %p161_p3 = scmp.lt.s32.totalorder (!%p138_p2), %s257_s13, 1  ;;  %v290_v3 = vmov (!%p138_p2), 839922192   ;;  %v180_v5 = vlaneseq (!%p138_p2) }
   0x6   : > { %141 = sbr.rel (%p138_p2) target bundleno = 146 (0x92), region = 32  ;;  %280 = vset.pattern.permute.xlu0 (!%p138_p2), %v289_v1  ;;  %v186_v2 = vld [vmem:[%s336_s2] sm:$0xf] (!%p138_p2)  ;;  %v178_v4 = vunpack.c.l.s4 (!%p138_p2), %v290_v3 }
   0x7   : > { %175 = vperm.xlu0 (!%p138_p2), %280, %v172_v0   ;;  %v181_v7 = vshrl.u32 (!%p138_p2), %v180_v5, 7 }
   0x8   : > { %v179_v6 = vunpack.c.0.s8 (!%p138_p2), %v178_v4 }
   0xa   : > { %v182_v8 = vsub.s32 (!%p138_p2), %v179_v6, %v181_v7 }
   0xb   : > { %189 = vperm.xlu0 (!%p138_p2), %280, %v186_v2  }
   0xd   : > { %s339_s13 = smov (!%p161_p3, %s257_s13), 1 }
   0xe   : > { %s268_s18 = sshll.u32 %s339_s13, 3 }
   0xf   : > { %s165_s21 = scalar_lea.vmem %s334_s0, %s268_s18  ;;  %s170_s24 = scalar_lea.vmem %s337_s3, %s268_s18 }
  0x10   : > { %v171_v11 = vld [vmem:[%s165_s21] sm:$0xff] }
  0x86   : > { %v176_v9 = vpop.permute.xlu0 %175 }
  0x87   : > { %v183_v10 = vrot.slane %v176_v9, %v182_v8 }
  0x89   : > { %v185_v13 = vmul.f32 %v183_v10, %v171_v11 }
  0x8a   : > { %v190_v12 = vpop.permute.xlu0 %189 }
  0x8b   : > { %v197_v14 = vrot.slane %v190_v12, %v182_v8 }
  0x8d   : > { %v199_v15 = vadd.f32 %v197_v14, %v185_v13 }
  0x8f   : > { %v200_v16 = vmax.f32 %v199_v15, 0.0 }
  0x91   : > { %201 = vst [vmem:[%s170_s24] sm:$0xff] %v200_v16 }
  0x92 PF: > { %s13_s12 = sadd.s32 1, %s287_s12  }
  0x93   : > { %p10_p4 = scmp.ge.s32.totalorder %s13_s12, 4  }
  0x95   :  { %12 = sbr.rel (!%p10_p4) target bundleno = 1 (0x1), region = 62 }

// kernel: resnet_block.3
= control target key start
LH: loop header
LB: loop body
LE: loop exit
PB: predicated region body
PF: predicated region fallthrough
CT: control target
= control target key end

     0   :  { %s991_s15 = smov 0   ;;  %s1103_s0 = inlined_call_operand.vmem [shape: bf16[2,4,326], index: 0, kind: input, shape index: {}]   ;;  %s1104_s1 = inlined_call_operand.vmem [shape: bf16[4,36], index: 1, kind: input, shape index: {}]   ;;  %s1105_s2 = inlined_call_operand.vmem [shape: bf16[2,4,288], index: 2, kind: output, shape index: {0}]   ;;  %s1106_s3 = inlined_call_operand.vmem [shape: f32[2,4,1], index: 3, kind: output, shape index: {1}]   ;;  %s1107_s4 = inlined_call_operand.vmem [shape: f32[2,4,1], index: 4, kind: output, shape index: {2}]  }
   0x1 LB: > { %s861_s16 = sadd.s32 4294967295, %s952_s15   ;;  %p865_p0 = scmp.ge.s32.totalorder %s952_s15, 1  ;;  %s952_s15 = sphi %s991_s15, %s15_s15  }
   0x2   : > { %p167_p1 = scmp.lt.s32.totalorder %s952_s15, 3 }
   0x4   : > { %p168_p2 = pnand %p865_p0, %p167_p1 }
   0x5   : > { %p201_p3 = scmp.lt.s32.totalorder (!%p168_p2), %s861_s16, 1  ;;  %v233_v0 = vlaneseq (!%p168_p2)  ;;  %v954_v1 = vmov (!%p168_p2), 1983009808   ;;  %s955_s21 = smov (!%p168_p2), 126   ;;  %vm240_vm0 = vcmask (!%p168_p2), 254976   ;;  %v959_v24 = vmov (!%p168_p2), 0.0  }
   0x6   : > { %171 = sbr.rel (%p168_p2) target bundleno = 546 (0x222), region = 28  ;;  %v231_v2 = vunpack.c.l.s4 (!%p168_p2), %v954_v1  ;;  %s956_s22 = smov (!%p168_p2), 127   ;;  %890 = vmatprep.subr.bf16.mxu1 (!%p168_p2), %v959_v24  ;;  %v964_v42 = vmov (!%p168_p2), 0   ;;  %vm965_vm1 = vmmov (!%p168_p2), 0   ;;  %vm272_vm2 = vcmask (!%p168_p2), 257026  }
   0x7   : > { %v234_v3 = vshrl.u32 (!%p168_p2), %v233_v0, 7  ;;  %s957_s23 = smov (!%p168_p2), 110   ;;  %s958_s24 = smov (!%p168_p2), 109   ;;  %581 = vmatprep.mubr.bf16.mxu0 (!%p168_p2), %v964_v42  ;;  %896 = vmatprep.mubr.msk.bf16.mxu1 (!%p168_p2), %vm965_vm1, %v959_v24  ;;  %vm265_vm3 = vcmask (!%p168_p2), 1043456   ;;  %vm298_vm4 = vcmask (!%p168_p2), 1031168   ;;  %vm267_vm5 = vcmask (!%p168_p2), 1039360  }
   0x8   : > { %v232_v4 = vunpack.c.0.s8 (!%p168_p2), %v231_v2  ;;  %s960_s25 = smov (!%p168_p2), 108   ;;  %s961_s26 = smov (!%p168_p2), 92   ;;  %vm358_vm6 = vcmask (!%p168_p2), 891904   ;;  %vm328_vm7 = vcmask (!%p168_p2), 900096   ;;  %vm388_vm8 = vcmask (!%p168_p2), 883712  }
   0x9   : > { %s962_s27 = smov (!%p168_p2), 91   ;;  %s963_s28 = smov (!%p168_p2), 90   ;;  %vm418_vm9 = vcmask (!%p168_p2), 752640   ;;  %vm448_vm10 = vcmask (!%p168_p2), 744448   ;;  %vm478_vm11 = vcmask (!%p168_p2), 736256   ;;  %vm539_vm12 = vcmask (!%p168_p2), 1041408  }
   0xa   : > { %v1003_v5 = vsub.s32 (!%p168_p2), %v232_v4, %v234_v3  ;;  %vm535_vm13 = vcmask (!%p168_p2), 293888  }
   0xd   : > { %s1109_s16 = smov (!%p201_p3, %s861_s16), 1 }
   0xe   : > { %s900_s17 = smul.u32 6, %s1109_s16  ;;  %s868_s8 = sshll.u32 %s1109_s16, 2 }
   0xf   : > { %s214_s11 = scalar_lea.vmem %s1106_s3, %s868_s8  ;;  %s218_s14 = scalar_lea.vmem %s1107_s4, %s868_s8 }
  0x10   : > { %s1010_s20 = scalar_lea.vmem %s1103_s0, %s900_s17  ;;  %s210_s7 = scalar_lea.vmem %s1105_s2, %s900_s17 }
  0x11   : > { %v274_v6 = vld [vmem:[%s1010_s20] sm:$0x3f] }
  0x12   : > { %v242_v7 = vld [vmem:[%s1010_s20] sm:$0x3f]  ;;  %v283_v9 = vrot.slane %v274_v6, %v1003_v5  ;;  %v276_v12 = vcombine.high %v274_v6, %v274_v6 }
  0x13   : > { %v304_v8 = vld [vmem:[%s1010_s20] sm:$0x3f]  ;;  %v258_v10 = vrot.slane %v242_v7, %v1003_v5  ;;  %v244_v14 = vcombine.low %v242_v7, %v242_v7 }
  0x14   : > { %v334_v11 = vld [vmem:[%s1010_s20] sm:$0x3f]  ;;  %291 = vrot.lane.b32.xlu1 %v283_v9, %s955_s21  ;;  %v320_v15 = vrot.slane %v304_v8, %v1003_v5  ;;  %v290_v19 = vrot.slane %v276_v12, %v1003_v5  ;;  %v306_v21 = vcombine.low %v304_v8, %v304_v8 }
  0x15   : > { %v220_v13 = vld [vmem:[%s1010_s20] sm:$0x3f]  ;;  %261 = vrot.lane.b32.xlu0 %v258_v10, %s956_s22  ;;  %v343_v16 = vrot.slane %v334_v11, %v1003_v5  ;;  %v336_v17 = vcombine.high %v334_v11, %v334_v11  ;;  %v251_v20 = vrot.slane %v244_v14, %v1003_v5 }
  0x16   : > { %870 = vst.sshfl [vmem:[#allocation2] sm:$0xf pattern:$0x76325410] %v220_v13  ;;  %v222_v18 = vcombine.high %v220_v13, %v220_v13  ;;  %v364_v22 = vld [vmem:[%s1010_s20] sm:$0x3f]  ;;  %v313_v26 = vrot.slane %v306_v21, %v1003_v5 }
  0x17   : > { %v350_v25 = vrot.slane %v336_v17, %v1003_v5  ;;  %v366_v27 = vcombine.low %v364_v22, %v364_v22  ;;  %v394_v28 = vld [vmem:[%s1010_s20] sm:$0x3f]  ;;  %v380_v29 = vrot.slane %v364_v22, %v1003_v5 }
  0x18   : > { %323 = vrot.lane.b32.xlu1 %v320_v15, %s957_s23  ;;  %v236_v23 = vrot.slane %v222_v18, %v1003_v5  ;;  %v396_v31 = vcombine.high %v394_v28, %v394_v28  ;;  %v424_v32 = vld [vmem:[%s1010_s20] sm:$0x3f]  ;;  %v403_v34 = vrot.slane %v394_v28, %v1003_v5 }
  0x19   : > { %351 = vrot.lane.b32.xlu0 %v343_v16, %s958_s24  ;;  %v373_v30 = vrot.slane %v366_v27, %v1003_v5  ;;  %v426_v35 = vcombine.low %v424_v32, %v424_v32  ;;  %v454_v36 = vld [vmem:[%s1010_s20] sm:$0x3f]  ;;  %v440_v37 = vrot.slane %v424_v32, %v1003_v5 }
  0x1a   : > { %241 = vst.msk [vmem:[#allocation2 + $0x8] sm:$0x3] %vm240_vm0, %v236_v23  ;;  %v410_v33 = vrot.slane %v396_v31, %v1003_v5  ;;  %v456_v39 = vcombine.high %v454_v36, %v454_v36  ;;  %v463_v41 = vrot.slane %v454_v36, %v1003_v5 }
  0x1b   : > { %v433_v38 = vrot.slane %v426_v35, %v1003_v5 }
  0x1c   : > { %293 = vrot.lane.b32.xlu1 %v290_v19, %s955_s21  ;;  %v470_v40 = vrot.slane %v456_v39, %v1003_v5 }
  0x1d   : > { %259 = vrot.lane.b32.xlu0 %v251_v20, %s956_s22 }
  0x20   : > { %353 = vrot.lane.b32.xlu1 %v350_v25, %s958_s24 }
  0x21   : > { %321 = vrot.lane.b32.xlu0 %v313_v26, %s957_s23 }
  0x24   : > { %383 = vrot.lane.b32.xlu1 %v380_v29, %s960_s25 }
  0x25   : > { %381 = vrot.lane.b32.xlu0 %v373_v30, %s960_s25 }
  0x28   : > { %413 = vrot.lane.b32.xlu1 %v410_v33, %s961_s26 }
  0x29   : > { %411 = vrot.lane.b32.xlu0 %v403_v34, %s961_s26 }
  0x2c   : > { %443 = vrot.lane.b32.xlu1 %v440_v37, %s962_s27 }
  0x2d   : > { %441 = vrot.lane.b32.xlu0 %v433_v38, %s962_s27 }
  0x30   : > { %473 = vrot.lane.b32.xlu1 %v470_v40, %s963_s28 }
  0x31   : > { %471 = vrot.lane.b32.xlu0 %v463_v41, %s963_s28  ;;  %v484_v41 = vld [vmem:[%s1104_s1] sm:$0x3] }
  0x86   : > { %v292_v43 = vpop.permute.xlu1 %291 }
  0x87   : > { %v262_v44 = vpop.permute.xlu0 %261  ;;  %v295_v49 = vrot.slane %v292_v43, 4 }
  0x88   : > { %273 = vst.msk [vmem:[#allocation2 + $0x8] sm:$0xc] %vm272_vm2, %v262_v44  ;;  %v264_v50 = vrot.slane %v262_v44, 4  ;;  %v631_v44 = vand.u32 127, %v233_v0 }
  0x8a   : > { %v324_v45 = vpop.permute.xlu1 %323 }
  0x8b   : > { %v352_v46 = vpop.permute.xlu0 %351  ;;  %333 = vst.msk [vmem:[#allocation2 + $0x14] sm:$0xc] %vm272_vm2, %v324_v45  ;;  %v326_v59 = vrot.slane %v324_v45, 4  ;;  %v633_v45 = vadd.s32 256, %v631_v44 }
  0x8c   : > { %v355_v60 = vrot.slane %v352_v46, 4 }
  0x8e   : > { %v294_v47 = vpop.permute.xlu1 %293 }
  0x8f   : > { %v260_v48 = vpop.permute.xlu0 %259  ;;  %v296_v51 = vrot.slane %v294_v47, 4  ;;  %303 = vst.msk [vmem:[#allocation2 + $0x14] sm:$0x3] %vm240_vm0, %v294_v47 }
  0x90   : > { %v263_v52 = vrot.slane %v260_v48, 4 }
  0x91   : > { %v297_v53 = vsel %vm265_vm3, %v295_v49, %v296_v51 }
  0x92   : > { %v266_v54 = vsel %vm265_vm3, %v263_v52, %v264_v50  ;;  %v299_v55 = vsel %vm298_vm4, %v292_v43, %v297_v53  ;;  %v354_v57 = vpop.permute.xlu1 %353  ;;  %v1069_v49 = vmul.u32.u64.low 3817748708, %v631_v44  ;;  %v1070_v50 = vmul.u32.u64.high 3817748708, %v631_v44, %v1069_v49 }
  0x93   : > { %v268_v56 = vsel %vm267_vm5, %v260_v48, %v266_v54  ;;  %v322_v58 = vpop.permute.xlu0 %321  ;;  %302 = vst [vmem:[#allocation2 + $0xc] sm:$0x33] %v299_v55  ;;  %v356_v61 = vrot.slane %v354_v57, 4  ;;  %363 = vst.msk [vmem:[#allocation2 + $0x20] sm:$0x3] %vm240_vm0, %v354_v57  ;;  %v632_v48 = vadd.s32 128, %v631_v44 }
  0x94   : > { %271 = vst [vmem:[#allocation2] sm:$0xcc] %v268_v56  ;;  %v325_v62 = vrot.slane %v322_v58, 4  ;;  %v640_v54 = vshrl.u32 %v1070_v50, 4 }
  0x95   : > { %v357_v63 = vsel %vm265_vm3, %v355_v60, %v356_v61  ;;  %v1072_v51 = vmul.u32.u64.low 3817748708, %v632_v48  ;;  %v1073_v52 = vmul.u32.u64.high 3817748708, %v632_v48, %v1072_v51 }
  0x96   : > { %v327_v1 = vsel %vm265_vm3, %v325_v62, %v326_v59  ;;  %v359_v2 = vsel %vm358_vm6, %v352_v46, %v357_v63  ;;  %v384_v4 = vpop.permute.xlu1 %383  ;;  %v936_v7 = vld [vmem:[#allocation2 + $0x8] ss:$12 sps:$4 sm:$0xff]   ;;  %v1066_v46 = vmul.u32.u64.low 3817748708, %v633_v45  ;;  %v1067_v47 = vmul.u32.u64.high 3817748708, %v633_v45, %v1066_v46 }
  0x97   : > { %v329_v3 = vsel %vm328_vm7, %v322_v58, %v327_v1  ;;  %v382_v6 = vpop.permute.xlu0 %381  ;;  %362 = vst [vmem:[#allocation2 + $0x18] sm:$0x33] %v359_v2  ;;  %v386_v8 = vrot.slane %v384_v4, 4  ;;  %393 = vst.msk [vmem:[#allocation2 + $0x20] sm:$0xc] %vm272_vm2, %v384_v4  ;;  %891 = vmatpush3.bf16.msra.mxu1 %v936_v7  ;;  %v651_v56 = vshrl.u32 %v1073_v52, 4 }
  0x98   : > { %332 = vst [vmem:[#allocation2 + $0xc] sm:$0xcc] %v329_v3  ;;  %v385_v9 = vrot.slane %v382_v6, 4  ;;  %892 = vmatprep.subr.bf16.mxu1 %v959_v24  ;;  %v662_v53 = vshrl.u32 %v1067_v47, 4  ;;  %v641_v57 = vmul.u32 18, %v640_v54 }
  0x99   : > { %v652_v58 = vmul.u32 18, %v651_v56 }
  0x9a   : > { %v387_v10 = vsel %vm265_vm3, %v385_v9, %v386_v8  ;;  %v414_v12 = vpop.permute.xlu1 %413  ;;  %v663_v55 = vmul.u32 18, %v662_v53  ;;  %v642_v59 = vsub.s32 %v631_v44, %v641_v57 }
  0x9b   : > { %v389_v11 = vsel %vm388_vm8, %v382_v6, %v387_v10  ;;  %v412_v13 = vpop.permute.xlu0 %411  ;;  %v416_v14 = vrot.slane %v414_v12, 4  ;;  %423 = vst.msk [vmem:[#allocation2 + $0x2c] sm:$0x3] %vm240_vm0, %v414_v12  ;;  %v485_v17 = vld [vmem:[#allocation2] sm:$0xff]  ;;  %v653_v60 = vsub.s32 %v632_v48, %v652_v58 }
  0x9c   : > { %392 = vst [vmem:[#allocation2 + $0x18] sm:$0xcc] %v389_v11  ;;  %v415_v15 = vrot.slane %v412_v13, 4  ;;  %v664_v0 = vsub.s32 %v633_v45, %v663_v55  ;;  %vm670_vm1 = vcmp.lt.s32.totalorder %v642_v59, 0  ;;  %v676_v62 = vadd.s32 18, %v642_v59 }
  0x9d   : > { %vm668_vm4 = vcmp.ne.s32.totalorder %v653_v60, 0  ;;  %vm671_vm5 = vcmp.lt.s32.totalorder %v653_v60, 0  ;;  %v677_v1 = vadd.s32 18, %v653_v60 }
  0x9e   : > { %v417_v16 = vsel %vm265_vm3, %v415_v15, %v416_v14  ;;  %v444_v19 = vpop.permute.xlu1 %443  ;;  %vm669_vm14 = vcmp.ne.s32.totalorder %v664_v0, 0  ;;  %vm672_vm15 = vcmp.lt.s32.totalorder %v664_v0, 0  ;;  %v678_v61 = vadd.s32 18, %v664_v0  ;;  %vm674_vm7 = vmand %vm671_vm5, %vm668_vm4 }
  0x9f   : > { %v419_v18 = vsel %vm418_vm9, %v412_v13, %v417_v16  ;;  %v442_v20 = vpop.permute.xlu0 %441  ;;  %v487_v21 = vld [vmem:[#allocation2 + $0xc] sm:$0xff]  ;;  %v446_v23 = vrot.slane %v444_v19, 4  ;;  %453 = vst.msk [vmem:[#allocation2 + $0x2c] sm:$0xc] %vm272_vm2, %v444_v19  ;;  %vm675_vm2 = vmand %vm672_vm15, %vm669_vm14  ;;  %v680_v4 = vsel %vm674_vm7, %v677_v1, %v653_v60  ;;  %vm741_vm14 = vcmask 259076  }
  0xa0   : > { %v937_v22 = vld [vmem:[#allocation2 + $0x4] ss:$12 sps:$4 sm:$0xff]   ;;  %422 = vst [vmem:[#allocation2 + $0x24] sm:$0x33] %v419_v18  ;;  %v445_v25 = vrot.slane %v442_v20, 4  ;;  %v871_v26 = vcombine.low %v485_v17, %v487_v21  ;;  %v681_v63 = vsel %vm675_vm2, %v678_v61, %v664_v0 }
  0xa1   : > { %549 = vmatprep.subr.bf16.mxu0 %v937_v22  ;;  %vm684_vm8 = vcmp.lt.s32.totalorder %v681_v63, 16 }
  0xa2   : > { %v447_v27 = vsel %vm265_vm3, %v445_v25, %v446_v23  ;;  %550 = vmatpush1.bf16.msra.mxu0 %v871_v26  ;;  %v474_v29 = vpop.permute.xlu1 %473 }
  0xa3   : > { %v449_v28 = vsel %vm448_vm10, %v442_v20, %v447_v27  ;;  %v472_v30 = vpop.permute.xlu0 %471  ;;  %v476_v31 = vrot.slane %v474_v29, 4  ;;  %483 = vst.msk [vmem:[#allocation2 + $0x38] sm:$0x3] %vm240_vm0, %v474_v29  ;;  %vm667_vm0 = vcmp.ne.s32.totalorder %v642_v59, 0  ;;  %vm739_vm10 = vcmask 1043458  }
  0xa4   : > { %452 = vst [vmem:[#allocation2 + $0x24] sm:$0xcc] %v449_v28  ;;  %v475_v32 = vrot.slane %v472_v30, 4  ;;  %vm673_vm6 = vmand %vm670_vm1, %vm667_vm0  ;;  %vm703_vm0 = vcmask 3072  }
  0xa5   : > { %v679_v2 = vsel %vm673_vm6, %v676_v62, %v642_v59  ;;  %vm740_vm15 = vmor %vm739_vm10, %vm539_vm12 }
  0xa6   : > { %v477_v33 = vsel %vm265_vm3, %v475_v32, %v476_v31  ;;  %v939_v35 = vld [vmem:[#allocation2 + $0x20] ss:$12 sps:$4 sm:$0xff]   ;;  %vm682_vm9 = vcmp.lt.s32.totalorder %v679_v2, 16 }
  0xa7   : > { %v479_v34 = vsel %vm478_vm11, %v472_v30, %v477_v33  ;;  %893 = vmatpush3.bf16.msra.mxu1 %v939_v35  ;;  %vm683_vm11 = vcmp.lt.s32.totalorder %v680_v4, 16 }
  0xa8   : > { %482 = vst [vmem:[#allocation2 + $0x30] sm:$0x33] %v479_v34  ;;  %894 = vmatprep.subr.bf16.mxu1 %v959_v24 }
  0xaa   : > { %v943_v38 = vld [vmem:[#allocation2 + $0x38] ss:$0 sps:$4 sm:$0x33]  }
  0xab   : > { %v940_v36 = vld [vmem:[#allocation2 + $0x1c] ss:$12 sps:$4 sm:$0xff]   ;;  %v942_v37 = vld [vmem:[#allocation2 + $0x18] ss:$12 sps:$4 sm:$0xff]   ;;  %v547_v39 = vsel %vm539_vm12, %v943_v38, 0 }
  0xac   : > { %551 = vmatprep.subr.bf16.mxu0 %v940_v36  ;;  %895 = vmatpush3.bf16.msra.mxu1 %v547_v39 }
  0xad   : > { %552 = vmatpush1.bf16.msra.mxu0 %v942_v37 }
  0xaf   : > { %v493_v40 = vld [vmem:[#allocation2 + $0x30] sm:$0x33]  ;;  %897 = vmatmul.mubr.msk.bf16.vlgmr.msra.gmra.mrb[0].mxu1 %vm535_vm13, %v484_v41 }
  0xb0   : > { %v878_v42 = vcombine.high %v493_v40, %v493_v40  ;;  %v877_v43 = vcombine.low %v493_v40, %v493_v40 }
  0xb2   : > { %880 = vmatprep.subr.msk.bf16.mxu0 %vm539_vm12, %v878_v42  ;;  %v541_v24 = vsel %vm539_vm12, %v877_v43, 0  ;;  %vm742_vm12 = vmor %vm741_vm14, %vm740_vm15 }
  0xb3   : > { %554 = vmatpush1.bf16.msra.mxu0 %v541_v24 }
  0xb6   : > { %881 = vmatmul.mubr.msk.bf16.vlgmr.msra.gmra.mrb[0].mxu0 %vm535_vm13, %v484_v41  ;;  %vm698_vm13 = vcmask 257024  }
 0x182   : > { %v624_v3 = vpop.f32.mrb[0].mxu1 }
 0x183   : > { %v718_v6 = vpack.c.bf16 %v624_v3, %v624_v3  ;;  %v898_v7 = vpop.f32.mrb[1].mxu1  ;;  %v693_v8 = vsel %vm684_vm8, %v624_v3, 0.0 }
 0x184   : > { %v627_v9 = vpop.f32.mrb[2].mxu1  ;;  %v707_v13 = vmul.f32 %v693_v8, %v624_v3  ;;  %v699_v25 = vsel %vm698_vm13, %v693_v8, 0.0 }
 0x185   : > { %v899_v10 = vpop.f32.mrb[3].mxu1  ;;  %v736_v14 = vrot.slane %v718_v6, %v1003_v5 }
 0x186   : > { %v711_v30 = vsel %vm698_vm13, %v707_v13, 0.0 }
 0x189   : > { %v583_v11 = vpop.f32.mrb[0].mxu0 }
 0x18a   : > { %v691_v12 = vsel %vm682_vm9, %v583_v11, 0.0  ;;  %v585_v15 = vpop.f32.mrb[1].mxu0 }
 0x18b   : > { %v705_v16 = vmul.f32 %v691_v12, %v583_v11  ;;  %v692_v17 = vsel %vm683_vm11, %v585_v15, 0.0  ;;  %v883_v18 = vpack.c.bf16 %v585_v15, %v583_v11  ;;  %v587_v19 = vpop.f32.mrb[2].mxu0  ;;  %v695_v20 = vsel %vm265_vm3, %v691_v12, 0.0 }
 0x18c   : > { %v706_v21 = vmul.f32 %v692_v17, %v585_v15  ;;  %v588_v22 = vpop.f32.mrb[3].mxu0  ;;  %v696_v23 = vsel %vm265_vm3, %v692_v17, 0.0 }
 0x18d   : > { %v729_v26 = vrot.slane %v883_v18, %v1003_v5  ;;  %v697_v27 = vadd.f32 %v696_v23, %v695_v20  ;;  %v708_v28 = vsel %vm265_vm3, %v705_v16, 0.0 }
 0x18e   : > { %v709_v29 = vsel %vm265_vm3, %v706_v21, 0.0 }
 0x18f   : > { %v737_v31 = vcombine.low %v729_v26, %v736_v14  ;;  %v700_v32 = vadd.f32 %v699_v25, %v697_v27  ;;  %v710_v33 = vadd.f32 %v709_v29, %v708_v28 }
 0x191   : > { %743 = vst.msk [vmem:[%s210_s7] sm:$0x3f] %vm742_vm12, %v737_v31  ;;  %701 = vadd.xlane.f32.xlu0 %v700_v32  ;;  %v712_v5 = vadd.f32 %v711_v30, %v710_v33 }
 0x193   : > { %713 = vadd.xlane.f32.xlu1 %v712_v5 }
 0x21e   : > { %v702_v34 = vpop.xlane.xlu0 %701 }
 0x21f   : > { %704 = vst.msk [vmem:[%s214_s11] sm:$0xf] %vm703_vm0, %v702_v34 }
 0x220   : > { %v714_v35 = vpop.xlane.xlu1 %713 }
 0x221   : > { %715 = vst.msk [vmem:[%s218_s14] sm:$0xf] %vm703_vm0, %v714_v35 }
 0x222 PF: > { %s15_s15 = sadd.s32 1, %s952_s15  }
 0x223   : > { %p12_p4 = scmp.ge.s32.totalorder %s15_s15, 4  }
 0x225   :  { %14 = sbr.rel (!%p12_p4) target bundleno = 1 (0x1), region = 82 }

// kernel: resnet_block.4
= control target key start
LH: loop header
LB: loop body
LE: loop exit
PB: predicated region body
PF: predicated region fallthrough
CT: control target
= control target key end

     0   :  { %s1435_s24 = smov 0   ;;  %s1760_s0 = inlined_call_operand.vmem [shape: bf16[2,4,288], index: 0, kind: input, shape index: {}]   ;;  %s1761_s1 = inlined_call_operand.vmem [shape: f32[4,1], index: 1, kind: input, shape index: {}]   ;;  %s1762_s2 = inlined_call_operand.vmem [shape: f32[4,1], index: 2, kind: input, shape index: {}]   ;;  %s1763_s3 = inlined_call_operand.vmem [shape: bf16[4,36], index: 3, kind: input, shape index: {}]   ;;  %s1764_s4 = inlined_call_operand.vmem [shape: f32[288,256], index: 4, kind: input, shape index: {}]   ;;  %s1765_s5 = inlined_call_operand.vmem [shape: f32[2,4,256], index: 5, kind: output, shape index: {0}]   ;;  %s1766_s6 = inlined_call_operand.vmem [shape: f32[2,4,1], index: 6, kind: output, shape index: {1}]   ;;  %s1767_s7 = inlined_call_operand.vmem [shape: f32[2,4,1], index: 7, kind: output, shape index: {2}]  }
   0x1 LB: > { %s1207_s25 = sadd.s32 4294967295, %s1379_s24   ;;  %p1211_p0 = scmp.ge.s32.totalorder %s1379_s24, 1  ;;  %s1379_s24 = sphi %s1435_s24, %s18_s24  }
   0x2   : > { %p242_p1 = scmp.lt.s32.totalorder %s1379_s24, 3 }
   0x4   : > { %p243_p2 = pnand %p1211_p0, %p242_p1 }
   0x5   : > { %vm403_vm0 = vcmask (!%p243_p2), 1041408   ;;  %vm404_vm1 = vcmask (!%p243_p2), 1043458   ;;  %vm406_vm2 = vcmask (!%p243_p2), 570372   ;;  %v304_v0 = vld [vmem:[%s1761_s1] sm:$0xf] (!%p243_p2)  ;;  %v1381_v1 = vmov (!%p243_p2), 0  }
   0x6   : > { %246 = sbr.rel (%p243_p2) target bundleno = 1031 (0x407), region = 40  ;;  %vm405_vm3 = vmor (!%p243_p2), %vm404_vm1, %vm403_vm0  ;;  %1352 = vset.pattern.permute.xlu0 (!%p243_p2), %v1381_v1  ;;  %802 = vmatprep.mubr.bf16.mxu1 (!%p243_p2), %v1381_v1  ;;  %v319_v2 = vld [vmem:[%s1762_s2] sm:$0xf] (!%p243_p2)  ;;  %v312_v3 = vlaneseq (!%p243_p2)  ;;  %p282_p3 = scmp.lt.s32.totalorder (!%p243_p2), %s1207_s25, 1  ;;  %v1382_v15 = vmov (!%p243_p2), 839922192  }
   0x7   : > { %vm407_vm4 = vmor (!%p243_p2), %vm406_vm2, %vm405_vm3  ;;  %307 = vperm.xlu0 (!%p243_p2), %1352, %v304_v0   ;;  %v310_v16 = vunpack.c.l.s4 (!%p243_p2), %v1382_v15  ;;  %v1383_v37 = vmov (!%p243_p2), 1983009808   ;;  %s1384_s11 = smov (!%p243_p2), 19   ;;  %vm437_vm3 = vcmask (!%p243_p2), 1041560   ;;  %s1385_s12 = smov (!%p243_p2), 126  }
   0x8   : > { %408 = vst.msk [vmem:[#allocation2] sm:$0x3f] (!%p243_p2), %vm407_vm4, %v1381_v1  ;;  %v337_v4 = vand.u32 (!%p243_p2), 127, %v312_v3  ;;  %v313_v21 = vshrl.u32 (!%p243_p2), %v312_v3, 7  ;;  %v417_v38 = vunpack.c.l.s4 (!%p243_p2), %v1383_v37  ;;  %vm438_vm4 = vmor (!%p243_p2), %vm404_vm1, %vm437_vm3  ;;  %s1386_s13 = smov (!%p243_p2), 127   ;;  %s1387_s14 = smov (!%p243_p2), 109  }
   0x9   : > { %v311_v20 = vunpack.c.0.s8 (!%p243_p2), %v310_v16  ;;  %s1388_s15 = smov (!%p243_p2), 110   ;;  %vm462_vm1 = vcmask (!%p243_p2), 254976   ;;  %s1389_s16 = smov (!%p243_p2), 92   ;;  %v851_v37 = vld [vmem:[%s1764_s4] sm:$0xff] (!%p243_p2)  ;;  %vm700_vm3 = vcmask (!%p243_p2), 736256  }
   0xa   : > { %v339_v5 = vadd.s32 (!%p243_p2), 256, %v337_v4  ;;  %v338_v6 = vadd.s32 (!%p243_p2), 128, %v337_v4  ;;  %v1454_v9 = vmul.u32.u64.low (!%p243_p2), 3817748708, %v337_v4  ;;  %v1455_v10 = vmul.u32.u64.high 3817748708, %v337_v4, %v1454_v9  ;;  %s1390_s17 = smov (!%p243_p2), 108   ;;  %s1391_s18 = smov (!%p243_p2), 91  }
   0xb   : > { %322 = vperm.xlu0 (!%p243_p2), %1352, %v319_v2   ;;  %v314_v25 = vsub.s32 (!%p243_p2), %v311_v20, %v313_v21  ;;  %v418_v48 = vunpack.c.0.s8 (!%p243_p2), %v417_v38  ;;  %s1392_s19 = smov (!%p243_p2), 90  }
   0xc   : > { %v1451_v7 = vmul.u32.u64.low (!%p243_p2), 3817748708, %v339_v5  ;;  %v1452_v8 = vmul.u32.u64.high 3817748708, %v339_v5, %v1451_v7  ;;  %v1457_v11 = vmul.u32.u64.low (!%p243_p2), 3817748708, %v338_v6  ;;  %v1458_v12 = vmul.u32.u64.high 3817748708, %v338_v6, %v1457_v11 }
   0xd   : > { %s1773_s25 = smov (!%p282_p3, %s1207_s25), 1  ;;  %v346_v14 = vshrl.u32 %v1455_v10, 4  ;;  %v1481_v53 = vsub.s32 %v418_v48, %v313_v21 }
   0xe   : > { %v368_v13 = vshrl.u32 %v1452_v8, 4  ;;  %v357_v17 = vshrl.u32 %v1458_v12, 4  ;;  %s1323_s30 = smul.u32 6, %s1773_s25  ;;  %s1215_s23 = sshll.u32 %s1773_s25, 2 }
   0xf   : > { %v347_v19 = vmul.u32 18, %v346_v14  ;;  %s295_s28 = scalar_lea.vmem %s1766_s6, %s1215_s23  ;;  %s299_s8 = scalar_lea.vmem %s1767_s7, %s1215_s23 }
  0x10   : > { %v369_v18 = vmul.u32 18, %v368_v13  ;;  %v358_v22 = vmul.u32 18, %v357_v17  ;;  %s286_s10 = scalar_lea.vmem %s1760_s0, %s1323_s30 }
  0x11   : > { %v348_v24 = vsub.s32 %v337_v4, %v347_v19  ;;  %v301_v26 = vld [vmem:[%s286_s10] sm:$0x3f] }
  0x12   : > { %v370_v23 = vsub.s32 %v339_v5, %v369_v18  ;;  %v359_v27 = vsub.s32 %v338_v6, %v358_v22  ;;  %v302_v29 = vunpack.c.l.bf16 %v301_v26  ;;  %v303_v30 = vunpack.c.h.bf16 %v301_v26 }
  0x13   : > { %vm373_vm7 = vcmp.ne.s32.totalorder %v348_v24, 0  ;;  %vm376_vm8 = vcmp.lt.s32.totalorder %v348_v24, 0  ;;  %v382_v35 = vadd.s32 18, %v348_v24 }
  0x14   : > { %vm375_vm5 = vcmp.ne.s32.totalorder %v370_v23, 0  ;;  %vm378_vm6 = vcmp.lt.s32.totalorder %v370_v23, 0  ;;  %v384_v32 = vadd.s32 18, %v370_v23  ;;  %vm374_vm9 = vcmp.ne.s32.totalorder %v359_v27, 0  ;;  %vm1473_vm12 = vmand %vm376_vm8, %vm373_vm7 }
  0x15   : > { %vm377_vm10 = vcmp.lt.s32.totalorder %v359_v27, 0  ;;  %vm1469_vm11 = vmand %vm378_vm6, %vm375_vm5  ;;  %v383_v36 = vadd.s32 18, %v359_v27  ;;  %v385_v44 = vsel %vm1473_vm12, %v382_v35, %v348_v24  ;;  %vm439_vm5 = vcmask 414724   ;;  %v852_v35 = vld [vmem:[%s1764_s4 + $0x8] sm:$0xff] }
  0x16   : > { %vm380_vm13 = vmand %vm377_vm10, %vm374_vm9  ;;  %v387_v42 = vsel %vm1469_vm11, %v384_v32, %v370_v23  ;;  %vm388_vm15 = vcmp.lt.s32.totalorder %v385_v44, 16  ;;  %vm434_vm6 = vcmask 154624   ;;  %v855_v44 = vld [vmem:[%s1764_s4 + $0x20] sm:$0xff]  ;;  %vm494_vm8 = vcmask 257026  }
  0x17   : > { %v386_v47 = vsel %vm380_vm13, %v383_v36, %v359_v27  ;;  %vm390_vm14 = vcmp.lt.s32.totalorder %v387_v42, 16  ;;  %vm440_vm7 = vmor %vm439_vm5, %vm438_vm4  ;;  %v854_v36 = vld [vmem:[%s1764_s4 + $0x18] sm:$0xff]  ;;  %vm487_vm9 = vcmask 1043456   ;;  %vm489_vm10 = vcmask 1039360  }
  0x18   : > { %vm389_vm2 = vcmp.lt.s32.totalorder %v386_v47, 16  ;;  %v1249_v38 = vpack.c.bf16 %v854_v36, %v852_v35  ;;  %v862_v47 = vld [vmem:[%s1764_s4 + $0x58] sm:$0xff]  ;;  %v893_v35 = vld [vmem:[%s1764_s4 + $0x150] sm:$0xff]  ;;  %v896_v36 = vld [vmem:[%s1764_s4 + $0x168] sm:$0xff]  ;;  %vm520_vm11 = vcmask 1031168   ;;  %vm550_vm12 = vcmask 900096  }
  0x19   : > { %vm580_vm13 = vcmask 891904   ;;  %vm757_vm4 = vcmask 293888   ;;  %vm1394_vm5 = vmmov 0  }
  0x1a   : > { %1250 = vmatprep.subr.bf16.mxu0 %v1249_v38 }
  0x86   : > { %v308_v28 = vpop.permute.xlu0 %307 }
  0x87   : > { %v315_v31 = vrot.slane %v308_v28, %v314_v25 }
  0x89   : > { %v317_v40 = vmul.f32 %v315_v31, %v302_v29  ;;  %v318_v41 = vmul.f32 %v315_v31, %v303_v30 }
  0x8a   : > { %v323_v39 = vpop.permute.xlu0 %322 }
  0x8b   : > { %v330_v43 = vrot.slane %v323_v39, %v314_v25  ;;  %v853_v39 = vld [vmem:[%s1764_s4 + $0x10] sm:$0xff] }
  0x8c   : > { %v1251_v42 = vpack.c.bf16 %v853_v39, %v851_v37  ;;  %v898_v37 = vld [vmem:[%s1764_s4 + $0x178] sm:$0xff] }
  0x8d   : > { %v332_v45 = vadd.f32 %v330_v43, %v317_v40  ;;  %v333_v46 = vadd.f32 %v330_v43, %v318_v41  ;;  %v856_v40 = vld [vmem:[%s1764_s4 + $0x28] sm:$0xff]  ;;  %v858_v41 = vld [vmem:[%s1764_s4 + $0x38] sm:$0xff]  ;;  %v1293_v39 = vpack.c.bf16 %v898_v37, %v896_v36 }
  0x8e   : > { %v1253_v43 = vpack.c.bf16 %v858_v41, %v856_v40  ;;  %1252 = vmatpush1.bf16.msra.mxu0 %v1251_v42  ;;  %v895_v40 = vld [vmem:[%s1764_s4 + $0x160] sm:$0xff]  ;;  %v897_v41 = vld [vmem:[%s1764_s4 + $0x170] sm:$0xff]  ;;  %v900_v42 = vld [vmem:[%s1764_s4 + $0x188] sm:$0xff] }
  0x8f   : > { %v334_v49 = vmax.f32 %v332_v45, 0.0  ;;  %v335_v50 = vmax.f32 %v333_v46, 0.0  ;;  %v857_v45 = vld [vmem:[%s1764_s4 + $0x30] sm:$0xff]  ;;  %v860_v46 = vld [vmem:[%s1764_s4 + $0x48] sm:$0xff] }
  0x90   : > { %v1255_v48 = vpack.c.bf16 %v857_v45, %v855_v44  ;;  %1254 = vmatprep.subr.bf16.mxu0 %v1253_v43  ;;  %v902_v43 = vld [vmem:[%s1764_s4 + $0x198] sm:$0xff]  ;;  %v1295_v44 = vpack.c.bf16 %v897_v41, %v895_v40 }
  0x91   : > { %v398_v51 = vcombine.high %v334_v49, %v334_v49  ;;  %v402_v52 = vsel %vm390_vm14, %v335_v50, 0.0  ;;  %v400_v55 = vsel %vm388_vm15, %v334_v49, 0.0  ;;  %v1257_v49 = vpack.c.bf16 %v862_v47, %v860_v46  ;;  %v859_v50 = vld [vmem:[%s1764_s4 + $0x40] sm:$0xff]  ;;  %v901_v47 = vld [vmem:[%s1764_s4 + $0x190] sm:$0xff] }
  0x92   : > { %v411_v54 = vpack.c.bf16 %v402_v52, %v402_v52  ;;  %v864_v52 = vld [vmem:[%s1764_s4 + $0x68] sm:$0xff]  ;;  %1256 = vmatpush1.bf16.msra.mxu0 %v1255_v48  ;;  %v1297_v45 = vpack.c.bf16 %v902_v43, %v900_v42  ;;  %v899_v46 = vld [vmem:[%s1764_s4 + $0x180] sm:$0xff]  ;;  %vm610_vm14 = vcmask 883712   ;;  %vm640_vm15 = vcmask 752640  }
  0x93   : > { %v401_v56 = vsel %vm389_vm2, %v398_v51, 0.0  ;;  %v861_v51 = vld [vmem:[%s1764_s4 + $0x50] sm:$0xff]  ;;  %1258 = vmatprep.subr.bf16.mxu0 %v1257_v49  ;;  %v904_v48 = vld [vmem:[%s1764_s4 + $0x1a8] sm:$0xff]  ;;  %v906_v49 = vld [vmem:[%s1764_s4 + $0x1b8] sm:$0xff]  ;;  %vm670_vm2 = vcmask 744448  }
  0x94   : > { %v1217_v57 = vpack.c.bf16 %v401_v56, %v400_v55  ;;  %v429_v59 = vrot.slane %v411_v54, %v1481_v53  ;;  %v1259_v54 = vpack.c.bf16 %v861_v51, %v859_v50  ;;  %v863_v56 = vld [vmem:[%s1764_s4 + $0x60] sm:$0xff]  ;;  %v1299_v50 = vpack.c.bf16 %v901_v47, %v899_v46 }
  0x95   : > { %v1301_v51 = vpack.c.bf16 %v906_v49, %v904_v48 }
  0x96   : > { %v422_v58 = vrot.slane %v1217_v57, %v1481_v53  ;;  %v865_v57 = vld [vmem:[%s1764_s4 + $0x70] sm:$0xff]  ;;  %1260 = vmatpush1.bf16.msra.mxu0 %v1259_v54  ;;  %v908_v54 = vld [vmem:[%s1764_s4 + $0x1c8] sm:$0xff] }
  0x98   : > { %v430_v60 = vcombine.low %v422_v58, %v429_v59  ;;  %v868_v58 = vld [vmem:[%s1764_s4 + $0x88] sm:$0xff]  ;;  %v870_v59 = vld [vmem:[%s1764_s4 + $0x98] sm:$0xff] }
  0x9a   : > { %431 = vrot.lane.b32.xlu1 %v430_v60, %s1384_s11  ;;  %v1263_v60 = vpack.c.bf16 %v865_v57, %v863_v56 }
 0x10c   : > { %v432_v61 = vpop.permute.xlu1 %431 }
 0x10d   : > { %v433_v62 = vrot.slane %v432_v61, 6 }
 0x10f   : > { %v435_v63 = vsel %vm434_vm6, %v433_v62, %v432_v61  ;;  %v1265_v61 = vpack.c.bf16 %v870_v59, %v868_v58  ;;  %v867_v62 = vld [vmem:[%s1764_s4 + $0x80] sm:$0xff]  ;;  %v909_v59 = vld [vmem:[%s1764_s4 + $0x1d0] sm:$0xff]  ;;  %vm1075_vm6 = vcmask 3072  }
 0x110   : > { %441 = vst.msk [vmem:[#allocation2] sm:$0x3f] %vm440_vm7, %v435_v63  ;;  %v869_v63 = vld [vmem:[%s1764_s4 + $0x90] sm:$0xff]  ;;  %v907_v58 = vld [vmem:[%s1764_s4 + $0x1c0] sm:$0xff] }
 0x117   : > { %v496_v0 = vld [vmem:[#allocation2] sm:$0x3f] }
 0x118   : > { %v464_v1 = vld [vmem:[#allocation2] sm:$0x3f]  ;;  %v505_v2 = vrot.slane %v496_v0, %v1481_v53  ;;  %v498_v19 = vcombine.high %v496_v0, %v496_v0  ;;  %v872_v0 = vld [vmem:[%s1764_s4 + $0xa8] sm:$0xff] }
 0x119   : > { %v480_v3 = vrot.slane %v464_v1, %v1481_v53  ;;  %v556_v4 = vld [vmem:[#allocation2] sm:$0x3f]  ;;  %v466_v14 = vcombine.low %v464_v1, %v464_v1  ;;  %v874_v1 = vld [vmem:[%s1764_s4 + $0xb8] sm:$0xff] }
 0x11a   : > { %v526_v5 = vld [vmem:[#allocation2] sm:$0x3f]  ;;  %513 = vrot.lane.b32.xlu1 %v505_v2, %s1385_s12  ;;  %v565_v7 = vrot.slane %v556_v4, %v1481_v53  ;;  %v512_v21 = vrot.slane %v498_v19, %v1481_v53  ;;  %v558_v23 = vcombine.high %v556_v4, %v556_v4  ;;  %v1267_v2 = vpack.c.bf16 %v869_v63, %v867_v62  ;;  %v886_v19 = vld [vmem:[%s1764_s4 + $0x118] sm:$0xff] }
 0x11b   : > { %v442_v6 = vld [vmem:[#allocation2] sm:$0x3f]  ;;  %483 = vrot.lane.b32.xlu0 %v480_v3, %s1386_s13  ;;  %v542_v8 = vrot.slane %v526_v5, %v1481_v53  ;;  %v473_v18 = vrot.slane %v466_v14, %v1481_v53  ;;  %v528_v20 = vcombine.low %v526_v5, %v526_v5  ;;  %v1269_v3 = vpack.c.bf16 %v874_v1, %v872_v0  ;;  %v873_v5 = vld [vmem:[%s1764_s4 + $0xb0] sm:$0xff] }
 0x11c   : > { %1218 = vst.sshfl [vmem:[#allocation3] sm:$0xf pattern:$0x76325410] %v442_v6  ;;  %v616_v9 = vld [vmem:[#allocation2] sm:$0x3f]  ;;  %v444_v11 = vcombine.high %v442_v6, %v442_v6  ;;  %v572_v25 = vrot.slane %v558_v23, %v1481_v53  ;;  %v1307_v62 = vpack.c.bf16 %v909_v59, %v907_v58 }
 0x11d   : > { %v586_v10 = vld [vmem:[#allocation2] sm:$0x3f]  ;;  %v625_v12 = vrot.slane %v616_v9, %v1481_v53  ;;  %v535_v22 = vrot.slane %v528_v20, %v1481_v53  ;;  %v618_v27 = vcombine.high %v616_v9, %v616_v9  ;;  %v876_v6 = vld [vmem:[%s1764_s4 + $0xc8] sm:$0xff]  ;;  %v885_v23 = vld [vmem:[%s1764_s4 + $0x110] sm:$0xff] }
 0x11e   : > { %573 = vrot.lane.b32.xlu1 %v565_v7, %s1387_s14  ;;  %v602_v13 = vrot.slane %v586_v10, %v1481_v53  ;;  %v458_v15 = vrot.slane %v444_v11, %v1481_v53  ;;  %v646_v16 = vld [vmem:[#allocation2] sm:$0x3f]  ;;  %v588_v24 = vcombine.low %v586_v10, %v586_v10  ;;  %v878_v7 = vld [vmem:[%s1764_s4 + $0xd8] sm:$0xff]  ;;  %v877_v11 = vld [vmem:[%s1764_s4 + $0xd0] sm:$0xff] }
 0x11f   : > { %545 = vrot.lane.b32.xlu0 %v542_v8, %s1388_s15  ;;  %v662_v17 = vrot.slane %v646_v16, %v1481_v53  ;;  %v648_v28 = vcombine.low %v646_v16, %v646_v16  ;;  %v676_v29 = vld [vmem:[#allocation2] sm:$0x3f]  ;;  %v632_v30 = vrot.slane %v618_v27, %v1481_v53  ;;  %v1273_v9 = vpack.c.bf16 %v878_v7, %v876_v6 }
 0x120   : > { %463 = vst.msk [vmem:[#allocation3 + $0x8] sm:$0x3] %vm462_vm1, %v458_v15  ;;  %v595_v26 = vrot.slane %v588_v24, %v1481_v53  ;;  %v678_v32 = vcombine.high %v676_v29, %v676_v29  ;;  %v685_v34 = vrot.slane %v676_v29, %v1481_v53  ;;  %v871_v4 = vld [vmem:[%s1764_s4 + $0xa0] sm:$0xff]  ;;  %v888_v24 = vld [vmem:[%s1764_s4 + $0x128] sm:$0xff]  ;;  %v889_v29 = vld [vmem:[%s1764_s4 + $0x130] sm:$0xff] }
 0x121   : > { %v655_v31 = vrot.slane %v648_v28, %v1481_v53  ;;  %v1271_v8 = vpack.c.bf16 %v873_v5, %v871_v4  ;;  %v875_v10 = vld [vmem:[%s1764_s4 + $0xc0] sm:$0xff] }
 0x122   : > { %633 = vrot.lane.b32.xlu1 %v625_v12, %s1389_s16  ;;  %v692_v33 = vrot.slane %v678_v32, %v1481_v53  ;;  %v866_v53 = vld [vmem:[%s1764_s4 + $0x78] sm:$0xff]  ;;  %v880_v12 = vld [vmem:[%s1764_s4 + $0xe8] sm:$0xff]  ;;  %v1275_v14 = vpack.c.bf16 %v877_v11, %v875_v10  ;;  %v879_v16 = vld [vmem:[%s1764_s4 + $0xe0] sm:$0xff] }
 0x123   : > { %605 = vrot.lane.b32.xlu0 %v602_v13, %s1390_s17  ;;  %v1261_v55 = vpack.c.bf16 %v866_v53, %v864_v52  ;;  %v882_v13 = vld [vmem:[%s1764_s4 + $0xf8] sm:$0xff]  ;;  %v887_v28 = vld [vmem:[%s1764_s4 + $0x120] sm:$0xff]  ;;  %v905_v53 = vld [vmem:[%s1764_s4 + $0x1b0] sm:$0xff] }
 0x124   : > { %v1277_v15 = vpack.c.bf16 %v882_v13, %v880_v12  ;;  %v1287_v32 = vpack.c.bf16 %v889_v29, %v887_v28  ;;  %v903_v52 = vld [vmem:[%s1764_s4 + $0x1a0] sm:$0xff] }
 0x125   : > { %1262 = vmatprep.subr.bf16.mxu0 %v1261_v55  ;;  %v910_v55 = vld [vmem:[%s1764_s4 + $0x1d8] sm:$0xff]  ;;  %v1303_v56 = vpack.c.bf16 %v905_v53, %v903_v52 }
 0x126   : > { %481 = vrot.lane.b32.xlu1 %v473_v18, %s1386_s13  ;;  %1264 = vmatpush1.bf16.msra.mxu0 %v1263_v60  ;;  %v884_v18 = vld [vmem:[%s1764_s4 + $0x108] sm:$0xff]  ;;  %v1305_v57 = vpack.c.bf16 %v910_v55, %v908_v54 }
 0x127   : > { %665 = vrot.lane.b32.xlu0 %v662_v17, %s1391_s18  ;;  %1266 = vmatprep.subr.bf16.mxu0 %v1265_v61  ;;  %v881_v17 = vld [vmem:[%s1764_s4 + $0xf0] sm:$0xff]  ;;  %v912_v60 = vld [vmem:[%s1764_s4 + $0x1e8] sm:$0xff]  ;;  %v914_v61 = vld [vmem:[%s1764_s4 + $0x1f8] sm:$0xff] }
 0x128   : > { %v1279_v20 = vpack.c.bf16 %v881_v17, %v879_v16  ;;  %v1309_v63 = vpack.c.bf16 %v914_v61, %v912_v60 }
 0x12a   : > { %543 = vrot.lane.b32.xlu1 %v535_v22, %s1388_s15  ;;  %1268 = vmatpush1.bf16.msra.mxu0 %v1267_v2  ;;  %v883_v22 = vld [vmem:[%s1764_s4 + $0x100] sm:$0xff] }
 0x12b   : > { %515 = vrot.lane.b32.xlu0 %v512_v21, %s1385_s12  ;;  %1270 = vmatprep.subr.bf16.mxu0 %v1269_v3  ;;  %v1281_v21 = vpack.c.bf16 %v886_v19, %v884_v18 }
 0x12e   : > { %603 = vrot.lane.b32.xlu1 %v595_v26, %s1390_s17  ;;  %1272 = vmatpush1.bf16.msra.mxu0 %v1271_v8  ;;  %v1283_v26 = vpack.c.bf16 %v885_v23, %v883_v22 }
 0x12f   : > { %575 = vrot.lane.b32.xlu0 %v572_v25, %s1387_s14  ;;  %1274 = vmatprep.subr.bf16.mxu0 %v1273_v9  ;;  %v890_v25 = vld [vmem:[%s1764_s4 + $0x138] sm:$0xff] }
 0x130   : > { %v1285_v27 = vpack.c.bf16 %v890_v25, %v888_v24 }
 0x132   : > { %663 = vrot.lane.b32.xlu1 %v655_v31, %s1391_s18  ;;  %1276 = vmatpush1.bf16.msra.mxu0 %v1275_v14  ;;  %v894_v31 = vld [vmem:[%s1764_s4 + $0x158] sm:$0xff] }
 0x133   : > { %635 = vrot.lane.b32.xlu0 %v632_v30, %s1389_s16  ;;  %1278 = vmatprep.subr.bf16.mxu0 %v1277_v15  ;;  %v892_v30 = vld [vmem:[%s1764_s4 + $0x148] sm:$0xff] }
 0x136   : > { %693 = vrot.lane.b32.xlu1 %v685_v34, %s1392_s19  ;;  %1280 = vmatpush1.bf16.msra.mxu0 %v1279_v20  ;;  %v891_v34 = vld [vmem:[%s1764_s4 + $0x140] sm:$0xff] }
 0x137   : > { %695 = vrot.lane.b32.xlu0 %v692_v33, %s1392_s19  ;;  %1282 = vmatprep.subr.bf16.mxu0 %v1281_v21  ;;  %v1289_v33 = vpack.c.bf16 %v894_v31, %v892_v30  ;;  %v1291_v38 = vpack.c.bf16 %v893_v35, %v891_v34  ;;  %s1234_s19 = sshll.u32 %s1773_s25, 3 }
 0x138   : > { %s291_s22 = scalar_lea.vmem %s1765_s5, %s1234_s19 }
 0x13a   : > { %1284 = vmatpush1.bf16.msra.mxu0 %v1283_v26 }
 0x13b   : > { %1286 = vmatprep.subr.bf16.mxu0 %v1285_v27 }
 0x13e   : > { %1288 = vmatpush1.bf16.msra.mxu0 %v1287_v32 }
 0x13f   : > { %1290 = vmatprep.subr.bf16.mxu0 %v1289_v33 }
 0x142   : > { %1292 = vmatpush1.bf16.msra.mxu0 %v1291_v38 }
 0x143   : > { %1294 = vmatprep.subr.bf16.mxu0 %v1293_v39 }
 0x146   : > { %1296 = vmatpush1.bf16.msra.mxu0 %v1295_v44 }
 0x147   : > { %1298 = vmatprep.subr.bf16.mxu0 %v1297_v45 }
 0x14a   : > { %1300 = vmatpush1.bf16.msra.mxu0 %v1299_v50 }
 0x14b   : > { %1302 = vmatprep.subr.bf16.mxu0 %v1301_v51 }
 0x14e   : > { %1304 = vmatpush1.bf16.msra.mxu0 %v1303_v56  ;;  %v706_v56 = vld [vmem:[%s1763_s3] sm:$0x3] }
 0x14f   : > { %1306 = vmatprep.subr.bf16.mxu0 %v1305_v57  ;;  %v1393_v57 = vmov 0.0  }
 0x152   : > { %1308 = vmatpush1.bf16.msra.mxu0 %v1307_v62  ;;  %v911_v62 = vld [vmem:[%s1764_s4 + $0x1e0] sm:$0xff] }
 0x153   : > { %1310 = vmatprep.subr.bf16.mxu0 %v1309_v63  ;;  %v913_v63 = vld [vmem:[%s1764_s4 + $0x1f0] sm:$0xff] }
 0x18c   : > { %v514_v0 = vpop.permute.xlu1 %513 }
 0x18d   : > { %v484_v1 = vpop.permute.xlu0 %483  ;;  %v517_v14 = vrot.slane %v514_v0, 4 }
 0x18e   : > { %495 = vst.msk [vmem:[#allocation3 + $0x8] sm:$0xc] %vm494_vm8, %v484_v1  ;;  %v486_v8 = vrot.slane %v484_v1, 4  ;;  %v916_v1 = vld [vmem:[%s1764_s4 + $0x208] sm:$0xff] }
 0x190   : > { %v574_v2 = vpop.permute.xlu1 %573 }
 0x191   : > { %v546_v3 = vpop.permute.xlu0 %545  ;;  %v577_v24 = vrot.slane %v574_v2, 4 }
 0x192   : > { %555 = vst.msk [vmem:[#allocation3 + $0x14] sm:$0xc] %vm494_vm8, %v546_v3  ;;  %v548_v15 = vrot.slane %v546_v3, 4  ;;  %v915_v3 = vld [vmem:[%s1764_s4 + $0x200] sm:$0xff] }
 0x194   : > { %v634_v4 = vpop.permute.xlu1 %633 }
 0x195   : > { %v606_v5 = vpop.permute.xlu0 %605  ;;  %v637_v34 = vrot.slane %v634_v4, 4 }
 0x196   : > { %615 = vst.msk [vmem:[#allocation3 + $0x20] sm:$0xc] %vm494_vm8, %v606_v5  ;;  %v608_v25 = vrot.slane %v606_v5, 4  ;;  %v917_v5 = vld [vmem:[%s1764_s4 + $0x210] sm:$0xff] }
 0x198   : > { %v482_v7 = vpop.permute.xlu1 %481 }
 0x199   : > { %v666_v6 = vpop.permute.xlu0 %665  ;;  %v485_v9 = vrot.slane %v482_v7, 4 }
 0x19a   : > { %675 = vst.msk [vmem:[#allocation3 + $0x2c] sm:$0xc] %vm494_vm8, %v666_v6  ;;  %v668_v35 = vrot.slane %v666_v6, 4  ;;  %v920_v6 = vld [vmem:[%s1764_s4 + $0x228] sm:$0xff] }
 0x19b   : > { %v488_v10 = vsel %vm487_vm9, %v485_v9, %v486_v8  ;;  %v1315_v8 = vpack.c.bf16 %v917_v5, %v915_v3 }
 0x19c   : > { %v490_v11 = vsel %vm489_vm10, %v482_v7, %v488_v10  ;;  %v544_v13 = vpop.permute.xlu1 %543  ;;  %v922_v7 = vld [vmem:[%s1764_s4 + $0x238] sm:$0xff]  ;;  %v919_v10 = vld [vmem:[%s1764_s4 + $0x220] sm:$0xff] }
 0x19d   : > { %v516_v12 = vpop.permute.xlu0 %515  ;;  %493 = vst [vmem:[#allocation3] sm:$0xcc] %v490_v11  ;;  %v547_v17 = vrot.slane %v544_v13, 4  ;;  %v1317_v9 = vpack.c.bf16 %v922_v7, %v920_v6  ;;  %v921_v11 = vld [vmem:[%s1764_s4 + $0x230] sm:$0xff] }
 0x19e   : > { %v518_v16 = vrot.slane %v516_v12, 4  ;;  %525 = vst.msk [vmem:[#allocation3 + $0x14] sm:$0x3] %vm462_vm1, %v516_v12  ;;  %v1319_v12 = vpack.c.bf16 %v921_v11, %v919_v10 }
 0x19f   : > { %v549_v19 = vsel %vm487_vm9, %v547_v17, %v548_v15 }
 0x1a0   : > { %v519_v18 = vsel %vm487_vm9, %v517_v14, %v518_v16  ;;  %v551_v21 = vsel %vm550_vm12, %v544_v13, %v549_v19  ;;  %v604_v23 = vpop.permute.xlu1 %603 }
 0x1a1   : > { %v521_v20 = vsel %vm520_vm11, %v514_v0, %v519_v18  ;;  %v576_v22 = vpop.permute.xlu0 %575  ;;  %554 = vst [vmem:[#allocation3 + $0xc] sm:$0xcc] %v551_v21  ;;  %v607_v27 = vrot.slane %v604_v23, 4  ;;  %v1311_v0 = vpack.c.bf16 %v913_v63, %v911_v62 }
 0x1a2   : > { %524 = vst [vmem:[#allocation3 + $0xc] sm:$0x33] %v521_v20  ;;  %v578_v26 = vrot.slane %v576_v22, 4  ;;  %585 = vst.msk [vmem:[#allocation3 + $0x20] sm:$0x3] %vm462_vm1, %v576_v22 }
 0x1a3   : > { %v609_v29 = vsel %vm487_vm9, %v607_v27, %v608_v25  ;;  %1312 = vmatpush1.bf16.msra.mxu0 %v1311_v0 }
 0x1a4   : > { %v579_v28 = vsel %vm487_vm9, %v577_v24, %v578_v26  ;;  %v611_v31 = vsel %vm610_vm14, %v604_v23, %v609_v29  ;;  %v664_v33 = vpop.permute.xlu1 %663 }
 0x1a5   : > { %v581_v30 = vsel %vm580_vm13, %v574_v2, %v579_v28  ;;  %v636_v32 = vpop.permute.xlu0 %635  ;;  %614 = vst [vmem:[#allocation3 + $0x18] sm:$0xcc] %v611_v31  ;;  %v667_v37 = vrot.slane %v664_v33, 4  ;;  %v1370_v58 = vld [vmem:[#allocation3 + $0x8] ss:$12 sps:$4 sm:$0xff]  }
 0x1a6   : > { %584 = vst [vmem:[#allocation3 + $0x18] sm:$0x33] %v581_v30  ;;  %v638_v36 = vrot.slane %v636_v32, 4  ;;  %645 = vst.msk [vmem:[#allocation3 + $0x2c] sm:$0x3] %vm462_vm1, %v636_v32  ;;  %v918_v2 = vld [vmem:[%s1764_s4 + $0x218] sm:$0xff] }
 0x1a7   : > { %v669_v39 = vsel %vm487_vm9, %v667_v37, %v668_v35 }
 0x1a8   : > { %v639_v38 = vsel %vm487_vm9, %v637_v34, %v638_v36  ;;  %v671_v41 = vsel %vm670_vm2, %v664_v33, %v669_v39  ;;  %v694_v43 = vpop.permute.xlu1 %693 }
 0x1a9   : > { %v641_v40 = vsel %vm640_vm15, %v634_v4, %v639_v38  ;;  %v696_v42 = vpop.permute.xlu0 %695  ;;  %v1362_v44 = vld [vmem:[#allocation3 + $0x4] ss:$12 sps:$4 sm:$0xff]   ;;  %v1364_v45 = vld [vmem:[#allocation3] ss:$12 sps:$4 sm:$0xff]   ;;  %674 = vst [vmem:[#allocation3 + $0x24] sm:$0xcc] %v671_v41  ;;  %v1313_v4 = vpack.c.bf16 %v918_v2, %v916_v1 }
 0x1aa   : > { %644 = vst [vmem:[#allocation3 + $0x24] sm:$0x33] %v641_v40  ;;  %v698_v46 = vrot.slane %v696_v42, 4  ;;  %705 = vst.msk [vmem:[#allocation3 + $0x38] sm:$0x3] %vm462_vm1, %v696_v42  ;;  %v697_v47 = vrot.slane %v694_v43, 4  ;;  %770 = vmatprep.subr.bf16.mxu1 %v1362_v44 }
 0x1ab   : > { %771 = vmatpush1.bf16.msra.mxu1 %v1364_v45 }
 0x1ac   : > { %v699_v48 = vsel %vm487_vm9, %v697_v47, %v698_v46 }
 0x1ad   : > { %v701_v49 = vsel %vm700_vm3, %v694_v43, %v699_v48  ;;  %v1371_v59 = vld [vmem:[#allocation3 + $0x20] ss:$12 sps:$4 sm:$0xff]  }
 0x1ae   : > { %704 = vst [vmem:[#allocation3 + $0x30] sm:$0x33] %v701_v49 }
 0x1b1   : > { %v1365_v50 = vld [vmem:[#allocation3 + $0x1c] ss:$12 sps:$4 sm:$0xff]   ;;  %v1367_v51 = vld [vmem:[#allocation3 + $0x18] ss:$12 sps:$4 sm:$0xff]  }
 0x1b2   : > { %772 = vmatprep.subr.bf16.mxu1 %v1365_v50  ;;  %v1372_v60 = vld [vmem:[#allocation3 + $0x38] ss:$0 sps:$4 sm:$0x33]  }
 0x1b3   : > { %773 = vmatpush1.bf16.msra.mxu1 %v1367_v51  ;;  %v768_v61 = vsel %vm403_vm0, %v1372_v60, 0 }
 0x1b5   : > { %v715_v52 = vld [vmem:[#allocation3 + $0x30] sm:$0x33] }
 0x1b6   : > { %v1226_v53 = vcombine.high %v715_v52, %v715_v52  ;;  %v1225_v54 = vcombine.low %v715_v52, %v715_v52 }
 0x1b8   : > { %1228 = vmatprep.subr.msk.bf16.mxu1 %vm403_vm0, %v1226_v53  ;;  %v762_v55 = vsel %vm403_vm0, %v1225_v54, 0  ;;  %vm923_vm0 = vcmask 261120  }
 0x1b9   : > { %775 = vmatpush1.bf16.msra.mxu1 %v762_v55 }
 0x1ba   : > { %1239 = vmatprep.subr.bf16.mxu1 %v1393_v57 }
 0x1bc   : > { %1229 = vmatmul.mubr.msk.bf16.vlgmr.msra.gmra.mrb[0].mxu1 %vm757_vm4, %v706_v56 }
 0x1bd   : > { %1240 = vmatpush3.bf16.msra.mxu1 %v1370_v58  ;;  %1245 = vmatprep.mubr.msk.bf16.mxu1 %vm1394_vm5, %v1393_v57 }
 0x1be   : > { %1241 = vmatprep.subr.bf16.mxu1 %v1393_v57 }
 0x1c1   : > { %1242 = vmatpush3.bf16.msra.mxu1 %v1371_v59 }
 0x1c2   : > { %1243 = vmatprep.subr.bf16.mxu1 %v1393_v57 }
 0x1c5   : > { %1244 = vmatpush3.bf16.msra.mxu1 %v768_v61 }
 0x1c6   : > { %1314 = vmatprep.subr.bf16.mxu1 %v1313_v4 }
 0x1c8   : > { %1246 = vmatmul.mubr.msk.bf16.vlgmr.msra.gmra.mrb[4].mxu1 %vm757_vm4, %v706_v56 }
 0x1c9   : > { %1062 = vmatprep.mubr.f32.mxu1 %v1393_v57  ;;  %1316 = vmatpush1.bf16.msra.mxu1 %v1315_v8 }
 0x1ca   : > { %1318 = vmatprep.subr.bf16.mxu1 %v1317_v9 }
 0x1cd   : > { %1320 = vmatpush1.bf16.msra.mxu1 %v1319_v12 }
 0x28f   : > { %v804_v13 = vpop.f32.mrb[0].mxu1 }
 0x290   : > { %v806_v14 = vpop.f32.mrb[1].mxu1 }
 0x291   : > { %v808_v15 = vpop.f32.mrb[2].mxu1  ;;  %991 = vmatprep.mubr.f32.mxu0 %v806_v14 }
 0x292   : > { %v809_v16 = vpop.f32.mrb[3].mxu1  ;;  %992 = vmatmul.mubr.f32.vlgmr.msra.gmra.mrb[0].mxu0 %v804_v13 }
 0x29b   : > { %v845_v17 = vpop.f32.mrb[4].mxu1 }
 0x29c   : > { %v1247_v18 = vpop.f32.mrb[5].mxu1  ;;  %1231 = vmatmul.mubr.msk.f32.vlgmr.msra.gmra.mrb[8].mxu1 %vm923_vm0, %v845_v17 }
 0x29d   : > { %v848_v19 = vpop.f32.mrb[6].mxu1 }
 0x29e   : > { %v1248_v20 = vpop.f32.mrb[7].mxu1 }
 0x365   : > { %v993_v21 = vpop.f32.mrb[0].mxu0 }
 0x366   : > { %v995_v22 = vpop.f32.mrb[1].mxu0 }
 0x36f   : > { %v1064_v23 = vpop.f32.mrb[8].mxu1 }
 0x370   : > { %v1065_v24 = vadd.f32 %v1064_v23, %v993_v21  ;;  %v1066_v25 = vpop.f32.mrb[9].mxu1 }
 0x371   : > { %v1067_v26 = vadd.f32 %v1066_v25, %v995_v22 }
 0x372   : > { %v1070_v27 = vsel %vm487_vm9, %v1065_v24, 0.0  ;;  %v1077_v28 = vmul.f32 %v1065_v24, %v1065_v24 }
 0x373   : > { %v1087_v29 = vcombine.low %v1065_v24, %v1067_v26  ;;  %v1071_v30 = vsel %vm487_vm9, %v1067_v26, 0.0  ;;  %v1078_v31 = vmul.f32 %v1067_v26, %v1067_v26 }
 0x374   : > { %v1072_v32 = vadd.f32 %v1071_v30, %v1070_v27  ;;  %v1079_v33 = vsel %vm487_vm9, %v1077_v28, 0.0 }
 0x375   : > { %1089 = vst [vmem:[%s291_s22] sm:$0xff] %v1087_v29  ;;  %v1080_v34 = vsel %vm487_vm9, %v1078_v31, 0.0 }
 0x376   : > { %1073 = vadd.xlane.f32.xlu1 %v1072_v32  ;;  %v1081_v35 = vadd.f32 %v1080_v34, %v1079_v33 }
 0x378   : > { %1082 = vadd.xlane.f32.xlu0 %v1081_v35 }
 0x403   : > { %v1074_v36 = vpop.xlane.xlu1 %1073 }
 0x404   : > { %1076 = vst.msk [vmem:[%s295_s28] sm:$0xf] %vm1075_vm6, %v1074_v36 }
 0x405   : > { %v1083_v37 = vpop.xlane.xlu0 %1082 }
 0x406   : > { %1084 = vst.msk [vmem:[%s299_s8] sm:$0xf] %vm1075_vm6, %v1083_v37 }
 0x407 PF: > { %s18_s24 = sadd.s32 1, %s1379_s24  }
 0x408   : > { %p15_p4 = scmp.ge.s32.totalorder %s18_s24, 4  }
 0x40a   :  { %17 = sbr.rel (!%p15_p4) target bundleno = 1 (0x1), region = 94 }

</bundles_post_ra>
